<compile_context>
chip_gen: v7x
topology: tpu7x:2x2x1
jax: 0.10.0
libtpu: 0.0.40
codegen_flags: <defaults>
</compile_context>

<pallas_src>
import math

import jax
import jax.numpy as jnp
from jax.experimental import pallas as pl
from jax.experimental.pallas import tpu as pltpu

# ---- scaled-down model dimensions (bert-base: H=768, 12 heads, 12 layers) ----
B, S, H = 2, 8, 32          # batch, seq, hidden
NUM_HEADS = 4
HEAD_DIM = H // NUM_HEADS
FFN = 4 * H                 # 128
VOCAB = 100
NUM_LABELS = 5
NUM_LAYERS = 2
LN_EPS = 1e-12
LOGITS_PAD = 128            # lane-dense logits slab, sliced to NUM_LABELS outside

# TODO(synk): full 12-layer bert-base-uncased weights are not loadable in a
# self-contained script; this is a deterministic synthetic stand-in.


def _layer_norm(x, gamma, beta):
    mu = jnp.mean(x, axis=-1, keepdims=True)
    var = jnp.mean((x - mu) ** 2, axis=-1, keepdims=True)
    return (x - mu) * jax.lax.rsqrt(var + LN_EPS) * gamma + beta


def _gelu_tanh(x):
    # TODO(synk): BERT uses the erf-based GELU; tanh approximation used here
    # (stays on the EUP), numerics differ at ~1e-3 level.
    c = math.sqrt(2.0 / math.pi)
    return 0.5 * x * (1.0 + jnp.tanh(c * (x + 0.044715 * x * x * x)))


# --------------------------- fused BERT kernel ------------------------------
# grid = (B, NUM_LAYERS):
#   axis 0 (batch) -> "parallel"  : independent rows, megacore/v7x sharding
#   axis 1 (layer) -> "arbitrary" : sequential; activations carried in x_sc

def fused_bert_kernel(
        emb_ref, mask_ref, embg_ref, embb_ref,
        wq_ref, bq_ref, wk_ref, bk_ref, wv_ref, bv_ref, wo_ref, bo_ref,
        g1_ref, b1_ref, w1_ref, f1_ref, w2_ref, f2_ref, g2_ref, b2_ref,
        pw_ref, pb_ref, cw_ref, cb_ref,
        emb_out_ref, hid_out_ref, logits_ref,
        x_sc, ctx_sc):
    layer = pl.program_id(1)

    # --- layer-0 prologue: BERT embedding LayerNorm (fused, no extra launch) ---
    @pl.when(layer == 0)
    def _():
        e = _layer_norm(emb_ref[0], embg_ref[...], embb_ref[...])
        x_sc[...] = e
        emb_out_ref[0] = e

    x = x_sc[...]                                    # (S, H) f32, VMEM-resident
    xb = x.astype(jnp.bfloat16)
    neg_bias = (1.0 - mask_ref[0]) * -1e9            # (1, S): -inf on masked keys

    # QKV projections: 2-D (S,H)@(H,H) matmuls, bf16 operands / f32 accumulation.
    q = jnp.dot(xb, wq_ref[0], preferred_element_type=jnp.float32) + bq_ref[0]
    k = jnp.dot(xb, wk_ref[0], preferred_element_type=jnp.float32) + bk_ref[0]
    v = jnp.dot(xb, wv_ref[0], preferred_element_type=jnp.float32) + bv_ref[0]

    # Multi-head self-attention.  Heads live in 8-lane groups; the per-head
    # score/context matmuls stay as a short static loop (a (S, heads, 8)
    # lane-split reshape/transpose does not lower reliably at HEAD_DIM=8), but
    # the output projection is a single (S,H)@(H,H) matmul on the full context.
    scale = 1.0 / math.sqrt(HEAD_DIM)
    for h in range(NUM_HEADS):
        sl = slice(h * HEAD_DIM, (h + 1) * HEAD_DIM)
        qh = q[:, sl].astype(jnp.bfloat16)
        kh = k[:, sl].astype(jnp.bfloat16)
        vh = v[:, sl].astype(jnp.bfloat16)
        s = jnp.einsum('qd,kd->qk', qh, kh,
                       preferred_element_type=jnp.float32) * scale
        s = s + neg_bias
        s = s - jnp.max(s, axis=-1, keepdims=True)   # f32 softmax
        p = jnp.exp(s)
        p = p / jnp.sum(p, axis=-1, keepdims=True)
        ctx_sc[:, sl] = jnp.dot(p.astype(jnp.bfloat16), vh,
                                preferred_element_type=jnp.float32)
    attn = jnp.dot(ctx_sc[...].astype(jnp.bfloat16), wo_ref[0],
                   preferred_element_type=jnp.float32) + bo_ref[0]
    # attention-output dropout (p=0.1) is identity in eval mode
    x1 = _layer_norm(x + attn, g1_ref[0], b1_ref[0])

    # FFN: (S,H)@(H,4H) -> GELU (f32) -> (S,4H)@(4H,H)
    hdn = jnp.dot(x1.astype(jnp.bfloat16), w1_ref[0],
                  preferred_element_type=jnp.float32) + f1_ref[0]
    hdn = _gelu_tanh(hdn)
    ffn = jnp.dot(hdn.astype(jnp.bfloat16), w2_ref[0],
                  preferred_element_type=jnp.float32) + f2_ref[0]
    # FFN-output dropout is identity in eval mode
    x2 = _layer_norm(x1 + ffn, g2_ref[0], b2_ref[0])

    x_sc[...] = x2                                   # carried to the next layer
    hid_out_ref[0, 0] = x2                           # this layer's hidden state

    # --- last-layer epilogue: BERT pooler + linear classification head --------
    @pl.when(layer == NUM_LAYERS - 1)
    def _():
        cls = x2[0:1, :]                             # [CLS] token, (1, H)
        pooled = jnp.tanh(
            jnp.dot(cls.astype(jnp.bfloat16), pw_ref[...],
                    preferred_element_type=jnp.float32) + pb_ref[...])
        # self.dropout (p=0.1) on pooled_output is identity in eval mode
        logits_ref[0] = jnp.dot(pooled.astype(jnp.bfloat16), cw_ref[...],
                                preferred_element_type=jnp.float32) + cb_ref[...]


# ------------------------------ parameters ---------------------------------

def init_params(key):
    keys = iter(jax.random.split(key, 32))

    def w_init(shape):
        return 0.02 * jax.random.normal(next(keys), shape, jnp.float32)

    def mm(shape):
        # matmul weights feed the MXU as bf16 (accumulation stays f32 in-kernel)
        return w_init(shape).astype(jnp.bfloat16)

    # classification head, zero-padded to a lane-dense 128-wide output
    cls_w = jnp.pad(w_init((H, NUM_LABELS)), ((0, 0), (0, LOGITS_PAD - NUM_LABELS)))
    cls_b = jnp.pad(w_init((1, NUM_LABELS)), ((0, 0), (0, LOGITS_PAD - NUM_LABELS)))

    return {
        'word_emb': w_init((VOCAB, H)),
        'pos_emb': w_init((S, H)),
        'type_emb': w_init((2, H)),
        'emb_ln_g': jnp.ones((1, H), jnp.float32),
        'emb_ln_b': jnp.zeros((1, H), jnp.float32),
        # per-layer weights stacked along a leading NUM_LAYERS axis
        'wq': mm((NUM_LAYERS, H, H)), 'bq': w_init((NUM_LAYERS, 1, H)),
        'wk': mm((NUM_LAYERS, H, H)), 'bk': w_init((NUM_LAYERS, 1, H)),
        'wv': mm((NUM_LAYERS, H, H)), 'bv': w_init((NUM_LAYERS, 1, H)),
        'wo': mm((NUM_LAYERS, H, H)), 'bo': w_init((NUM_LAYERS, 1, H)),
        'ln1_g': jnp.ones((NUM_LAYERS, 1, H), jnp.float32),
        'ln1_b': jnp.zeros((NUM_LAYERS, 1, H), jnp.float32),
        'w_ff1': mm((NUM_LAYERS, H, FFN)), 'b_ff1': w_init((NUM_LAYERS, 1, FFN)),
        'w_ff2': mm((NUM_LAYERS, FFN, H)), 'b_ff2': w_init((NUM_LAYERS, 1, H)),
        'ln2_g': jnp.ones((NUM_LAYERS, 1, H), jnp.float32),
        'ln2_b': jnp.zeros((NUM_LAYERS, 1, H), jnp.float32),
        'pool_w': mm((H, H)), 'pool_b': w_init((1, H)),
        'cls_w': cls_w.astype(jnp.bfloat16), 'cls_b': cls_b,
    }


# ------------------------------- forward -----------------------------------

def personality_model_forward(params, input_ids, attention_mask, labels=None):
    # --- BERT embedding gathers are glue; everything downstream is ONE kernel ---
    emb = (jnp.take(params['word_emb'], input_ids, axis=0)
           + params['pos_emb'][None, :, :]
           + params['type_emb'][0][None, None, :])
    mask_f = attention_mask.astype(jnp.float32).reshape(B, 1, S)

    def per_batch(shape):
        nd = len(shape)
        return pl.BlockSpec((1,) + shape, lambda b, l, _n=nd: (b,) + (0,) * _n)

    def per_layer(shape):
        nd = len(shape)
        return pl.BlockSpec((1,) + shape, lambda b, l, _n=nd: (l,) + (0,) * _n)

    def shared(shape):
        nd = len(shape)
        return pl.BlockSpec(shape, lambda b, l, _n=nd: (0,) * _n)

    in_specs = [
        per_batch((S, H)),                                 # embeddings
        per_batch((1, S)),                                 # attention mask
        shared((1, H)), shared((1, H)),                    # embedding LayerNorm
        per_layer((H, H)), per_layer((1, H)),              # wq, bq
        per_layer((H, H)), per_layer((1, H)),              # wk, bk
        per_layer((H, H)), per_layer((1, H)),              # wv, bv
        per_layer((H, H)), per_layer((1, H)),              # wo, bo
        per_layer((1, H)), per_layer((1, H)),              # ln1 gamma, beta
        per_layer((H, FFN)), per_layer((1, FFN)),          # w_ff1, b_ff1
        per_layer((FFN, H)), per_layer((1, H)),            # w_ff2, b_ff2
        per_layer((1, H)), per_layer((1, H)),              # ln2 gamma, beta
        shared((H, H)), shared((1, H)),                    # pooler
        shared((H, LOGITS_PAD)), shared((1, LOGITS_PAD)),  # classifier (padded)
    ]
    out_specs = (
        per_batch((S, H)),                                      # embedding hidden
        pl.BlockSpec((1, 1, S, H), lambda b, l: (l, b, 0, 0)),  # per-layer hidden
        per_batch((1, LOGITS_PAD)),                             # lane-dense logits
    )
    out_shape = (
        jax.ShapeDtypeStruct((B, S, H), jnp.float32),
        jax.ShapeDtypeStruct((NUM_LAYERS, B, S, H), jnp.float32),
        jax.ShapeDtypeStruct((B, 1, LOGITS_PAD), jnp.float32),
    )

    emb_hid, layer_hid, logits_pad = pl.pallas_call(
        fused_bert_kernel,
        out_shape=out_shape,
        grid_spec=pltpu.PrefetchScalarGridSpec(
            num_scalar_prefetch=0,
            grid=(B, NUM_LAYERS),
            in_specs=in_specs,
            out_specs=out_specs,
            scratch_shapes=[pltpu.VMEM((S, H), jnp.float32),    # resident activations
                            pltpu.VMEM((S, H), jnp.float32)]),  # attention context
        compiler_params=pltpu.CompilerParams(
            dimension_semantics=("parallel", "arbitrary"),
            vmem_limit_bytes=48 * 1024 * 1024),
    )(emb, mask_f,
      params['emb_ln_g'], params['emb_ln_b'],
      params['wq'], params['bq'], params['wk'], params['bk'],
      params['wv'], params['bv'], params['wo'], params['bo'],
      params['ln1_g'], params['ln1_b'],
      params['w_ff1'], params['b_ff1'], params['w_ff2'], params['b_ff2'],
      params['ln2_g'], params['ln2_b'],
      params['pool_w'], params['pool_b'], params['cls_w'], params['cls_b'])

    logits = logits_pad[:, 0, :NUM_LABELS]
    hidden_states = (emb_hid,) + tuple(layer_hid[i] for i in range(NUM_LAYERS))

    # nn.MSELoss (mean) over (B, NUM_LABELS): 10-element glue, computed only
    # when labels are provided (skipped entirely on the inference path).
    loss = jnp.mean((logits - labels) ** 2) if labels is not None else None

    return {'loss': loss, 'logits': logits, 'hidden_states': hidden_states}


# --------------------------------- main -------------------------------------

if __name__ == "__main__":
    key = jax.random.PRNGKey(0)
    k_param, k_ids, k_lab = jax.random.split(key, 3)

    params = init_params(k_param)
    input_ids = jax.random.randint(k_ids, (B, S), 0, VOCAB, dtype=jnp.int32)
    attention_mask = jnp.ones((B, S), dtype=jnp.int32)
    labels = jax.random.uniform(k_lab, (B, NUM_LABELS), dtype=jnp.float32)

    out = personality_model_forward(params, input_ids, attention_mask, labels)
    jax.block_until_ready(out['logits'])
    jax.block_until_ready(out['loss'])

    assert out['logits'].shape == (B, NUM_LABELS)
    assert out['loss'].shape == ()
    assert len(out['hidden_states']) == NUM_LAYERS + 1
    assert all(h.shape == (B, S, H) for h in out['hidden_states'])
    assert bool(jnp.all(jnp.isfinite(out['logits'])))
    print("KERNEL_OK")
</pallas_src>

<mosaic_0001>
module attributes {stable_mosaic.version = 11 : i64} {
  func.func @fused_bert_kernel(%arg0: i32, %arg1: i32, %arg2: memref<1x8x32xf32, #tpu.memory_space<vmem>>, %arg3: memref<1x1x8xf32, #tpu.memory_space<vmem>>, %arg4: memref<1x32xf32, #tpu.memory_space<vmem>>, %arg5: memref<1x32xf32, #tpu.memory_space<vmem>>, %arg6: memref<1x32x32xbf16, #tpu.memory_space<vmem>>, %arg7: memref<1x1x32xf32, #tpu.memory_space<vmem>>, %arg8: memref<1x32x32xbf16, #tpu.memory_space<vmem>>, %arg9: memref<1x1x32xf32, #tpu.memory_space<vmem>>, %arg10: memref<1x32x32xbf16, #tpu.memory_space<vmem>>, %arg11: memref<1x1x32xf32, #tpu.memory_space<vmem>>, %arg12: memref<1x32x32xbf16, #tpu.memory_space<vmem>>, %arg13: memref<1x1x32xf32, #tpu.memory_space<vmem>>, %arg14: memref<1x1x32xf32, #tpu.memory_space<vmem>>, %arg15: memref<1x1x32xf32, #tpu.memory_space<vmem>>, %arg16: memref<1x32x128xbf16, #tpu.memory_space<vmem>>, %arg17: memref<1x1x128xf32, #tpu.memory_space<vmem>>, %arg18: memref<1x128x32xbf16, #tpu.memory_space<vmem>>, %arg19: memref<1x1x32xf32, #tpu.memory_space<vmem>>, %arg20: memref<1x1x32xf32, #tpu.memory_space<vmem>>, %arg21: memref<1x1x32xf32, #tpu.memory_space<vmem>>, %arg22: memref<32x32xbf16, #tpu.memory_space<vmem>>, %arg23: memref<1x32xf32, #tpu.memory_space<vmem>>, %arg24: memref<32x128xbf16, #tpu.memory_space<vmem>>, %arg25: memref<1x128xf32, #tpu.memory_space<vmem>>, %arg26: memref<1x8x32xf32, #tpu.memory_space<vmem>>, %arg27: memref<1x1x8x32xf32, #tpu.memory_space<vmem>>, %arg28: memref<1x1x128xf32, #tpu.memory_space<vmem>>, %arg29: memref<8x32xf32, #tpu.memory_space<vmem>>, %arg30: memref<8x32xf32, #tpu.memory_space<vmem>>) attributes {dimension_semantics = [#tpu.dimension_semantics<parallel>, #tpu.dimension_semantics<arbitrary>], iteration_bounds = array<i64: 2, 2>, scalar_prefetch = 0 : i64, scratch_operands = 2 : i64, tpu.core_type = #tpu.core_type<tc>, window_params = [{transform_indices = @transform_0, window_bounds = array<i64: 1, 8, 32>}, {transform_indices = @transform_1, window_bounds = array<i64: 1, 1, 8>}, {pipeline_mode = #tpu.pipeline_mode<synchronous>, transform_indices = @transform_2, window_bounds = array<i64: 1, 32>}, {pipeline_mode = #tpu.pipeline_mode<synchronous>, transform_indices = @transform_3, window_bounds = array<i64: 1, 32>}, {transform_indices = @transform_4, window_bounds = array<i64: 1, 32, 32>}, {transform_indices = @transform_5, window_bounds = array<i64: 1, 1, 32>}, {transform_indices = @transform_6, window_bounds = array<i64: 1, 32, 32>}, {transform_indices = @transform_7, window_bounds = array<i64: 1, 1, 32>}, {transform_indices = @transform_8, window_bounds = array<i64: 1, 32, 32>}, {transform_indices = @transform_9, window_bounds = array<i64: 1, 1, 32>}, {transform_indices = @transform_10, window_bounds = array<i64: 1, 32, 32>}, {transform_indices = @transform_11, window_bounds = array<i64: 1, 1, 32>}, {transform_indices = @transform_12, window_bounds = array<i64: 1, 1, 32>}, {transform_indices = @transform_13, window_bounds = array<i64: 1, 1, 32>}, {transform_indices = @transform_14, window_bounds = array<i64: 1, 32, 128>}, {transform_indices = @transform_15, window_bounds = array<i64: 1, 1, 128>}, {transform_indices = @transform_16, window_bounds = array<i64: 1, 128, 32>}, {transform_indices = @transform_17, window_bounds = array<i64: 1, 1, 32>}, {transform_indices = @transform_18, window_bounds = array<i64: 1, 1, 32>}, {transform_indices = @transform_19, window_bounds = array<i64: 1, 1, 32>}, {pipeline_mode = #tpu.pipeline_mode<synchronous>, transform_indices = @transform_20, window_bounds = array<i64: 32, 32>}, {pipeline_mode = #tpu.pipeline_mode<synchronous>, transform_indices = @transform_21, window_bounds = array<i64: 1, 32>}, {pipeline_mode = #tpu.pipeline_mode<synchronous>, transform_indices = @transform_22, window_bounds = array<i64: 32, 128>}, {pipeline_mode = #tpu.pipeline_mode<synchronous>, transform_indices = @transform_23, window_bounds = array<i64: 1, 128>}, {transform_indices = @transform_24, window_bounds = array<i64: 1, 8, 32>}, {transform_indices = @transform_25, window_bounds = array<i64: 1, 1, 8, 32>}, {transform_indices = @transform_26, window_bounds = array<i64: 1, 1, 128>}]} {
    %c0_i32 = arith.constant 0 : i32
    %0 = arith.cmpi eq, %arg1, %c0_i32 : i32
    %1 = arith.extui %0 : i1 to i32
    %c0_i32_0 = arith.constant 0 : i32
    %2 = arith.cmpi ne, %1, %c0_i32_0 : i32
    scf.if %2 {
      %c0_108 = arith.constant 0 : index
      %c0_109 = arith.constant 0 : index
      %c0_110 = arith.constant 0 : index
      %223 = vector.load %arg2[%c0_108, %c0_109, %c0_110] : memref<1x8x32xf32, #tpu.memory_space<vmem>>, vector<1x8x32xf32>
      %224 = vector.shape_cast %223 : vector<1x8x32xf32> to vector<8x32xf32>
      %c0_111 = arith.constant 0 : index
      %c0_112 = arith.constant 0 : index
      %225 = vector.load %arg4[%c0_111, %c0_112] : memref<1x32xf32, #tpu.memory_space<vmem>>, vector<1x32xf32>
      %c0_113 = arith.constant 0 : index
      %c0_114 = arith.constant 0 : index
      %226 = vector.load %arg5[%c0_113, %c0_114] : memref<1x32xf32, #tpu.memory_space<vmem>>, vector<1x32xf32>
      %cst_115 = arith.constant dense<0.000000e+00> : vector<8xf32>
      %227 = vector.multi_reduction <add>, %224, %cst_115 [1] : vector<8x32xf32> to vector<8xf32>
      %228 = vector.shape_cast %227 : vector<8xf32> to vector<8x1xf32>
      %cst_116 = arith.constant 3.200000e+01 : f32
      %229 = vector.broadcast %cst_116 : f32 to vector<8x1xf32>
      %230 = arith.divf %228, %229 : vector<8x1xf32>
      %231 = vector.broadcast %230 : vector<8x1xf32> to vector<8x32xf32>
      %232 = arith.subf %224, %231 : vector<8x32xf32>
      %233 = arith.mulf %232, %232 : vector<8x32xf32>
      %cst_117 = arith.constant dense<0.000000e+00> : vector<8xf32>
      %234 = vector.multi_reduction <add>, %233, %cst_117 [1] : vector<8x32xf32> to vector<8xf32>
      %235 = vector.shape_cast %234 : vector<8xf32> to vector<8x1xf32>
      %cst_118 = arith.constant 3.200000e+01 : f32
      %236 = vector.broadcast %cst_118 : f32 to vector<8x1xf32>
      %237 = arith.divf %235, %236 : vector<8x1xf32>
      %238 = vector.broadcast %230 : vector<8x1xf32> to vector<8x32xf32>
      %239 = arith.subf %224, %238 : vector<8x32xf32>
      %cst_119 = arith.constant 9.99999996E-13 : f32
      %240 = vector.broadcast %cst_119 : f32 to vector<8x1xf32>
      %241 = arith.addf %237, %240 : vector<8x1xf32>
      %242 = math.rsqrt %241 : vector<8x1xf32>
      %243 = vector.broadcast %242 : vector<8x1xf32> to vector<8x32xf32>
      %244 = arith.mulf %239, %243 : vector<8x32xf32>
      %245 = vector.broadcast %225 : vector<1x32xf32> to vector<8x32xf32>
      %246 = arith.mulf %244, %245 : vector<8x32xf32>
      %247 = vector.broadcast %226 : vector<1x32xf32> to vector<8x32xf32>
      %248 = arith.addf %246, %247 : vector<8x32xf32>
      %c0_120 = arith.constant 0 : index
      %c0_121 = arith.constant 0 : index
      %249 = vector.load %arg29[%c0_120, %c0_121] : memref<8x32xf32, #tpu.memory_space<vmem>>, vector<8x32xf32>
      tpu.vector_store %arg29[%c0_120, %c0_121], %248 {strides = array<i32>} : memref<8x32xf32, #tpu.memory_space<vmem>>, vector<8x32xf32>,
      %c0_122 = arith.constant 0 : index
      %c0_123 = arith.constant 0 : index
      %c0_124 = arith.constant 0 : index
      %250 = vector.load %arg26[%c0_122, %c0_123, %c0_124] : memref<1x8x32xf32, #tpu.memory_space<vmem>>, vector<1x8x32xf32>
      %251 = vector.shape_cast %250 : vector<1x8x32xf32> to vector<8x32xf32>
      %252 = vector.shape_cast %248 : vector<8x32xf32> to vector<1x8x32xf32>
      tpu.vector_store %arg26[%c0_122, %c0_123, %c0_124], %252 {strides = array<i32>} : memref<1x8x32xf32, #tpu.memory_space<vmem>>, vector<1x8x32xf32>,
    } else {
    }
    %c0 = arith.constant 0 : index
    %c0_1 = arith.constant 0 : index
    %3 = vector.load %arg29[%c0, %c0_1] : memref<8x32xf32, #tpu.memory_space<vmem>>, vector<8x32xf32>
    %4 = arith.truncf %3 : vector<8x32xf32> to vector<8x32xbf16>
    %c0_2 = arith.constant 0 : index
    %c0_3 = arith.constant 0 : index
    %c0_4 = arith.constant 0 : index
    %5 = vector.load %arg3[%c0_2, %c0_3, %c0_4] : memref<1x1x8xf32, #tpu.memory_space<vmem>>, vector<1x1x8xf32>
    %6 = vector.shape_cast %5 : vector<1x1x8xf32> to vector<1x8xf32>
    %cst = arith.constant 1.000000e+00 : f32
    %7 = vector.broadcast %cst : f32 to vector<1x8xf32>
    %8 = arith.subf %7, %6 : vector<1x8xf32>
    %cst_5 = arith.constant -1.000000e+09 : f32
    %9 = vector.broadcast %cst_5 : f32 to vector<1x8xf32>
    %10 = arith.mulf %8, %9 : vector<1x8xf32>
    %c0_6 = arith.constant 0 : index
    %c0_7 = arith.constant 0 : index
    %c0_8 = arith.constant 0 : index
    %11 = vector.load %arg6[%c0_6, %c0_7, %c0_8] : memref<1x32x32xbf16, #tpu.memory_space<vmem>>, vector<1x32x32xbf16>
    %12 = vector.shape_cast %11 : vector<1x32x32xbf16> to vector<32x32xbf16>
    %cst_9 = arith.constant dense<0.000000e+00> : vector<8x32xf32>
    %13 = tpu.matmul %4, %12, %cst_9 {dimension_numbers = #tpu.dot_dimension_numbers<[1], [0], [0], [1], [0, 0, 1, 1], [], []>} : vector<8x32xbf16>, vector<32x32xbf16>, vector<8x32xf32> -> vector<8x32xf32>
    %c0_10 = arith.constant 0 : index
    %c0_11 = arith.constant 0 : index
    %c0_12 = arith.constant 0 : index
    %14 = vector.load %arg7[%c0_10, %c0_11, %c0_12] : memref<1x1x32xf32, #tpu.memory_space<vmem>>, vector<1x1x32xf32>
    %15 = vector.shape_cast %14 : vector<1x1x32xf32> to vector<1x32xf32>
    %16 = vector.broadcast %15 : vector<1x32xf32> to vector<8x32xf32>
    %17 = arith.addf %13, %16 : vector<8x32xf32>
    %c0_13 = arith.constant 0 : index
    %c0_14 = arith.constant 0 : index
    %c0_15 = arith.constant 0 : index
    %18 = vector.load %arg8[%c0_13, %c0_14, %c0_15] : memref<1x32x32xbf16, #tpu.memory_space<vmem>>, vector<1x32x32xbf16>
    %19 = vector.shape_cast %18 : vector<1x32x32xbf16> to vector<32x32xbf16>
    %cst_16 = arith.constant dense<0.000000e+00> : vector<8x32xf32>
    %20 = tpu.matmul %4, %19, %cst_16 {dimension_numbers = #tpu.dot_dimension_numbers<[1], [0], [0], [1], [0, 0, 1, 1], [], []>} : vector<8x32xbf16>, vector<32x32xbf16>, vector<8x32xf32> -> vector<8x32xf32>
    %c0_17 = arith.constant 0 : index
    %c0_18 = arith.constant 0 : index
    %c0_19 = arith.constant 0 : index
    %21 = vector.load %arg9[%c0_17, %c0_18, %c0_19] : memref<1x1x32xf32, #tpu.memory_space<vmem>>, vector<1x1x32xf32>
    %22 = vector.shape_cast %21 : vector<1x1x32xf32> to vector<1x32xf32>
    %23 = vector.broadcast %22 : vector<1x32xf32> to vector<8x32xf32>
    %24 = arith.addf %20, %23 : vector<8x32xf32>
    %c0_20 = arith.constant 0 : index
    %c0_21 = arith.constant 0 : index
    %c0_22 = arith.constant 0 : index
    %25 = vector.load %arg10[%c0_20, %c0_21, %c0_22] : memref<1x32x32xbf16, #tpu.memory_space<vmem>>, vector<1x32x32xbf16>
    %26 = vector.shape_cast %25 : vector<1x32x32xbf16> to vector<32x32xbf16>
    %cst_23 = arith.constant dense<0.000000e+00> : vector<8x32xf32>
    %27 = tpu.matmul %4, %26, %cst_23 {dimension_numbers = #tpu.dot_dimension_numbers<[1], [0], [0], [1], [0, 0, 1, 1], [], []>} : vector<8x32xbf16>, vector<32x32xbf16>, vector<8x32xf32> -> vector<8x32xf32>
    %c0_24 = arith.constant 0 : index
    %c0_25 = arith.constant 0 : index
    %c0_26 = arith.constant 0 : index
    %28 = vector.load %arg11[%c0_24, %c0_25, %c0_26] : memref<1x1x32xf32, #tpu.memory_space<vmem>>, vector<1x1x32xf32>
    %29 = vector.shape_cast %28 : vector<1x1x32xf32> to vector<1x32xf32>
    %30 = vector.broadcast %29 : vector<1x32xf32> to vector<8x32xf32>
    %31 = arith.addf %27, %30 : vector<8x32xf32>
    %32 = vector.extract_strided_slice %17 {offsets = [0, 0], sizes = [8, 8], strides = [1, 1]} : vector<8x32xf32> to vector<8x8xf32>
    %33 = arith.truncf %32 : vector<8x8xf32> to vector<8x8xbf16>
    %34 = vector.extract_strided_slice %24 {offsets = [0, 0], sizes = [8, 8], strides = [1, 1]} : vector<8x32xf32> to vector<8x8xf32>
    %35 = arith.truncf %34 : vector<8x8xf32> to vector<8x8xbf16>
    %36 = vector.extract_strided_slice %31 {offsets = [0, 0], sizes = [8, 8], strides = [1, 1]} : vector<8x32xf32> to vector<8x8xf32>
    %37 = arith.truncf %36 : vector<8x8xf32> to vector<8x8xbf16>
    "tpu.trace_start"() <{level = 10 : i32, message = "qd,kd->qk"}> : () -> ()
    %cst_27 = arith.constant dense<0.000000e+00> : vector<8x8xf32>
    %38 = tpu.matmul %33, %35, %cst_27 {dimension_numbers = #tpu.dot_dimension_numbers<[1], [1], [0], [0], [0, 0, 1, 0], [], []>} : vector<8x8xbf16>, vector<8x8xbf16>, vector<8x8xf32> -> vector<8x8xf32>
    "tpu.trace_stop"() : () -> ()
    %cst_28 = arith.constant 0.353553385 : f32
    %39 = vector.broadcast %cst_28 : f32 to vector<8x8xf32>
    %40 = arith.mulf %38, %39 : vector<8x8xf32>
    %41 = vector.broadcast %10 : vector<1x8xf32> to vector<8x8xf32>
    %42 = arith.addf %40, %41 : vector<8x8xf32>
    %cst_29 = arith.constant dense<0xFF800000> : vector<8xf32>
    %43 = vector.multi_reduction <maximumf>, %42, %cst_29 [1] : vector<8x8xf32> to vector<8xf32>
    %44 = vector.shape_cast %43 : vector<8xf32> to vector<8x1xf32>
    %45 = vector.broadcast %44 : vector<8x1xf32> to vector<8x8xf32>
    %46 = arith.subf %42, %45 : vector<8x8xf32>
    %47 = math.exp %46 : vector<8x8xf32>
    %cst_30 = arith.constant dense<0.000000e+00> : vector<8xf32>
    %48 = vector.multi_reduction <add>, %47, %cst_30 [1] : vector<8x8xf32> to vector<8xf32>
    %49 = vector.shape_cast %48 : vector<8xf32> to vector<8x1xf32>
    %50 = vector.broadcast %49 : vector<8x1xf32> to vector<8x8xf32>
    %51 = arith.divf %47, %50 : vector<8x8xf32>
    %52 = arith.truncf %51 : vector<8x8xf32> to vector<8x8xbf16>
    %cst_31 = arith.constant dense<0.000000e+00> : vector<8x8xf32>
    %53 = tpu.matmul %52, %37, %cst_31 {dimension_numbers = #tpu.dot_dimension_numbers<[1], [0], [0], [1], [0, 0, 1, 1], [], []>} : vector<8x8xbf16>, vector<8x8xbf16>, vector<8x8xf32> -> vector<8x8xf32>
    %c0_32 = arith.constant 0 : index
    %c0_33 = arith.constant 0 : index
    %54 = vector.load %arg30[%c0_32, %c0_33] : memref<8x32xf32, #tpu.memory_space<vmem>>, vector<8x8xf32>
    tpu.vector_store %arg30[%c0_32, %c0_33], %53 {strides = array<i32>} : memref<8x32xf32, #tpu.memory_space<vmem>>, vector<8x8xf32>,
    %55 = vector.extract_strided_slice %17 {offsets = [0, 8], sizes = [8, 8], strides = [1, 1]} : vector<8x32xf32> to vector<8x8xf32>
    %56 = arith.truncf %55 : vector<8x8xf32> to vector<8x8xbf16>
    %57 = vector.extract_strided_slice %24 {offsets = [0, 8], sizes = [8, 8], strides = [1, 1]} : vector<8x32xf32> to vector<8x8xf32>
    %58 = arith.truncf %57 : vector<8x8xf32> to vector<8x8xbf16>
    %59 = vector.extract_strided_slice %31 {offsets = [0, 8], sizes = [8, 8], strides = [1, 1]} : vector<8x32xf32> to vector<8x8xf32>
    %60 = arith.truncf %59 : vector<8x8xf32> to vector<8x8xbf16>
    "tpu.trace_start"() <{level = 10 : i32, message = "qd,kd->qk"}> : () -> ()
    %cst_34 = arith.constant dense<0.000000e+00> : vector<8x8xf32>
    %61 = tpu.matmul %56, %58, %cst_34 {dimension_numbers = #tpu.dot_dimension_numbers<[1], [1], [0], [0], [0, 0, 1, 0], [], []>} : vector<8x8xbf16>, vector<8x8xbf16>, vector<8x8xf32> -> vector<8x8xf32>
    "tpu.trace_stop"() : () -> ()
    %cst_35 = arith.constant 0.353553385 : f32
    %62 = vector.broadcast %cst_35 : f32 to vector<8x8xf32>
    %63 = arith.mulf %61, %62 : vector<8x8xf32>
    %64 = vector.broadcast %10 : vector<1x8xf32> to vector<8x8xf32>
    %65 = arith.addf %63, %64 : vector<8x8xf32>
    %cst_36 = arith.constant dense<0xFF800000> : vector<8xf32>
    %66 = vector.multi_reduction <maximumf>, %65, %cst_36 [1] : vector<8x8xf32> to vector<8xf32>
    %67 = vector.shape_cast %66 : vector<8xf32> to vector<8x1xf32>
    %68 = vector.broadcast %67 : vector<8x1xf32> to vector<8x8xf32>
    %69 = arith.subf %65, %68 : vector<8x8xf32>
    %70 = math.exp %69 : vector<8x8xf32>
    %cst_37 = arith.constant dense<0.000000e+00> : vector<8xf32>
    %71 = vector.multi_reduction <add>, %70, %cst_37 [1] : vector<8x8xf32> to vector<8xf32>
    %72 = vector.shape_cast %71 : vector<8xf32> to vector<8x1xf32>
    %73 = vector.broadcast %72 : vector<8x1xf32> to vector<8x8xf32>
    %74 = arith.divf %70, %73 : vector<8x8xf32>
    %75 = arith.truncf %74 : vector<8x8xf32> to vector<8x8xbf16>
    %cst_38 = arith.constant dense<0.000000e+00> : vector<8x8xf32>
    %76 = tpu.matmul %75, %60, %cst_38 {dimension_numbers = #tpu.dot_dimension_numbers<[1], [0], [0], [1], [0, 0, 1, 1], [], []>} : vector<8x8xbf16>, vector<8x8xbf16>, vector<8x8xf32> -> vector<8x8xf32>
    %c0_39 = arith.constant 0 : index
    %c8 = arith.constant 8 : index
    %77 = vector.load %arg30[%c0_39, %c8] : memref<8x32xf32, #tpu.memory_space<vmem>>, vector<8x8xf32>
    tpu.vector_store %arg30[%c0_39, %c8], %76 {strides = array<i32>} : memref<8x32xf32, #tpu.memory_space<vmem>>, vector<8x8xf32>,
    %78 = vector.extract_strided_slice %17 {offsets = [0, 16], sizes = [8, 8], strides = [1, 1]} : vector<8x32xf32> to vector<8x8xf32>
    %79 = arith.truncf %78 : vector<8x8xf32> to vector<8x8xbf16>
    %80 = vector.extract_strided_slice %24 {offsets = [0, 16], sizes = [8, 8], strides = [1, 1]} : vector<8x32xf32> to vector<8x8xf32>
    %81 = arith.truncf %80 : vector<8x8xf32> to vector<8x8xbf16>
    %82 = vector.extract_strided_slice %31 {offsets = [0, 16], sizes = [8, 8], strides = [1, 1]} : vector<8x32xf32> to vector<8x8xf32>
    %83 = arith.truncf %82 : vector<8x8xf32> to vector<8x8xbf16>
    "tpu.trace_start"() <{level = 10 : i32, message = "qd,kd->qk"}> : () -> ()
    %cst_40 = arith.constant dense<0.000000e+00> : vector<8x8xf32>
    %84 = tpu.matmul %79, %81, %cst_40 {dimension_numbers = #tpu.dot_dimension_numbers<[1], [1], [0], [0], [0, 0, 1, 0], [], []>} : vector<8x8xbf16>, vector<8x8xbf16>, vector<8x8xf32> -> vector<8x8xf32>
    "tpu.trace_stop"() : () -> ()
    %cst_41 = arith.constant 0.353553385 : f32
    %85 = vector.broadcast %cst_41 : f32 to vector<8x8xf32>
    %86 = arith.mulf %84, %85 : vector<8x8xf32>
    %87 = vector.broadcast %10 : vector<1x8xf32> to vector<8x8xf32>
    %88 = arith.addf %86, %87 : vector<8x8xf32>
    %cst_42 = arith.constant dense<0xFF800000> : vector<8xf32>
    %89 = vector.multi_reduction <maximumf>, %88, %cst_42 [1] : vector<8x8xf32> to vector<8xf32>
    %90 = vector.shape_cast %89 : vector<8xf32> to vector<8x1xf32>
    %91 = vector.broadcast %90 : vector<8x1xf32> to vector<8x8xf32>
    %92 = arith.subf %88, %91 : vector<8x8xf32>
    %93 = math.exp %92 : vector<8x8xf32>
    %cst_43 = arith.constant dense<0.000000e+00> : vector<8xf32>
    %94 = vector.multi_reduction <add>, %93, %cst_43 [1] : vector<8x8xf32> to vector<8xf32>
    %95 = vector.shape_cast %94 : vector<8xf32> to vector<8x1xf32>
    %96 = vector.broadcast %95 : vector<8x1xf32> to vector<8x8xf32>
    %97 = arith.divf %93, %96 : vector<8x8xf32>
    %98 = arith.truncf %97 : vector<8x8xf32> to vector<8x8xbf16>
    %cst_44 = arith.constant dense<0.000000e+00> : vector<8x8xf32>
    %99 = tpu.matmul %98, %83, %cst_44 {dimension_numbers = #tpu.dot_dimension_numbers<[1], [0], [0], [1], [0, 0, 1, 1], [], []>} : vector<8x8xbf16>, vector<8x8xbf16>, vector<8x8xf32> -> vector<8x8xf32>
    %c0_45 = arith.constant 0 : index
    %c16 = arith.constant 16 : index
    %100 = vector.load %arg30[%c0_45, %c16] : memref<8x32xf32, #tpu.memory_space<vmem>>, vector<8x8xf32>
    tpu.vector_store %arg30[%c0_45, %c16], %99 {strides = array<i32>} : memref<8x32xf32, #tpu.memory_space<vmem>>, vector<8x8xf32>,
    %101 = vector.extract_strided_slice %17 {offsets = [0, 24], sizes = [8, 8], strides = [1, 1]} : vector<8x32xf32> to vector<8x8xf32>
    %102 = arith.truncf %101 : vector<8x8xf32> to vector<8x8xbf16>
    %103 = vector.extract_strided_slice %24 {offsets = [0, 24], sizes = [8, 8], strides = [1, 1]} : vector<8x32xf32> to vector<8x8xf32>
    %104 = arith.truncf %103 : vector<8x8xf32> to vector<8x8xbf16>
    %105 = vector.extract_strided_slice %31 {offsets = [0, 24], sizes = [8, 8], strides = [1, 1]} : vector<8x32xf32> to vector<8x8xf32>
    %106 = arith.truncf %105 : vector<8x8xf32> to vector<8x8xbf16>
    "tpu.trace_start"() <{level = 10 : i32, message = "qd,kd->qk"}> : () -> ()
    %cst_46 = arith.constant dense<0.000000e+00> : vector<8x8xf32>
    %107 = tpu.matmul %102, %104, %cst_46 {dimension_numbers = #tpu.dot_dimension_numbers<[1], [1], [0], [0], [0, 0, 1, 0], [], []>} : vector<8x8xbf16>, vector<8x8xbf16>, vector<8x8xf32> -> vector<8x8xf32>
    "tpu.trace_stop"() : () -> ()
    %cst_47 = arith.constant 0.353553385 : f32
    %108 = vector.broadcast %cst_47 : f32 to vector<8x8xf32>
    %109 = arith.mulf %107, %108 : vector<8x8xf32>
    %110 = vector.broadcast %10 : vector<1x8xf32> to vector<8x8xf32>
    %111 = arith.addf %109, %110 : vector<8x8xf32>
    %cst_48 = arith.constant dense<0xFF800000> : vector<8xf32>
    %112 = vector.multi_reduction <maximumf>, %111, %cst_48 [1] : vector<8x8xf32> to vector<8xf32>
    %113 = vector.shape_cast %112 : vector<8xf32> to vector<8x1xf32>
    %114 = vector.broadcast %113 : vector<8x1xf32> to vector<8x8xf32>
    %115 = arith.subf %111, %114 : vector<8x8xf32>
    %116 = math.exp %115 : vector<8x8xf32>
    %cst_49 = arith.constant dense<0.000000e+00> : vector<8xf32>
    %117 = vector.multi_reduction <add>, %116, %cst_49 [1] : vector<8x8xf32> to vector<8xf32>
    %118 = vector.shape_cast %117 : vector<8xf32> to vector<8x1xf32>
    %119 = vector.broadcast %118 : vector<8x1xf32> to vector<8x8xf32>
    %120 = arith.divf %116, %119 : vector<8x8xf32>
    %121 = arith.truncf %120 : vector<8x8xf32> to vector<8x8xbf16>
    %cst_50 = arith.constant dense<0.000000e+00> : vector<8x8xf32>
    %122 = tpu.matmul %121, %106, %cst_50 {dimension_numbers = #tpu.dot_dimension_numbers<[1], [0], [0], [1], [0, 0, 1, 1], [], []>} : vector<8x8xbf16>, vector<8x8xbf16>, vector<8x8xf32> -> vector<8x8xf32>
    %c0_51 = arith.constant 0 : index
    %c24 = arith.constant 24 : index
    %123 = vector.load %arg30[%c0_51, %c24] : memref<8x32xf32, #tpu.memory_space<vmem>>, vector<8x8xf32>
    tpu.vector_store %arg30[%c0_51, %c24], %122 {strides = array<i32>} : memref<8x32xf32, #tpu.memory_space<vmem>>, vector<8x8xf32>,
    %c0_52 = arith.constant 0 : index
    %c0_53 = arith.constant 0 : index
    %124 = vector.load %arg30[%c0_52, %c0_53] : memref<8x32xf32, #tpu.memory_space<vmem>>, vector<8x32xf32>
    %125 = arith.truncf %124 : vector<8x32xf32> to vector<8x32xbf16>
    %c0_54 = arith.constant 0 : index
    %c0_55 = arith.constant 0 : index
    %c0_56 = arith.constant 0 : index
    %126 = vector.load %arg12[%c0_54, %c0_55, %c0_56] : memref<1x32x32xbf16, #tpu.memory_space<vmem>>, vector<1x32x32xbf16>
    %127 = vector.shape_cast %126 : vector<1x32x32xbf16> to vector<32x32xbf16>
    %cst_57 = arith.constant dense<0.000000e+00> : vector<8x32xf32>
    %128 = tpu.matmul %125, %127, %cst_57 {dimension_numbers = #tpu.dot_dimension_numbers<[1], [0], [0], [1], [0, 0, 1, 1], [], []>} : vector<8x32xbf16>, vector<32x32xbf16>, vector<8x32xf32> -> vector<8x32xf32>
    %c0_58 = arith.constant 0 : index
    %c0_59 = arith.constant 0 : index
    %c0_60 = arith.constant 0 : index
    %129 = vector.load %arg13[%c0_58, %c0_59, %c0_60] : memref<1x1x32xf32, #tpu.memory_space<vmem>>, vector<1x1x32xf32>
    %130 = vector.shape_cast %129 : vector<1x1x32xf32> to vector<1x32xf32>
    %131 = vector.broadcast %130 : vector<1x32xf32> to vector<8x32xf32>
    %132 = arith.addf %128, %131 : vector<8x32xf32>
    %133 = arith.addf %3, %132 : vector<8x32xf32>
    %c0_61 = arith.constant 0 : index
    %c0_62 = arith.constant 0 : index
    %c0_63 = arith.constant 0 : index
    %134 = vector.load %arg14[%c0_61, %c0_62, %c0_63] : memref<1x1x32xf32, #tpu.memory_space<vmem>>, vector<1x1x32xf32>
    %135 = vector.shape_cast %134 : vector<1x1x32xf32> to vector<1x32xf32>
    %c0_64 = arith.constant 0 : index
    %c0_65 = arith.constant 0 : index
    %c0_66 = arith.constant 0 : index
    %136 = vector.load %arg15[%c0_64, %c0_65, %c0_66] : memref<1x1x32xf32, #tpu.memory_space<vmem>>, vector<1x1x32xf32>
    %137 = vector.shape_cast %136 : vector<1x1x32xf32> to vector<1x32xf32>
    %cst_67 = arith.constant dense<0.000000e+00> : vector<8xf32>
    %138 = vector.multi_reduction <add>, %133, %cst_67 [1] : vector<8x32xf32> to vector<8xf32>
    %139 = vector.shape_cast %138 : vector<8xf32> to vector<8x1xf32>
    %cst_68 = arith.constant 3.200000e+01 : f32
    %140 = vector.broadcast %cst_68 : f32 to vector<8x1xf32>
    %141 = arith.divf %139, %140 : vector<8x1xf32>
    %142 = vector.broadcast %141 : vector<8x1xf32> to vector<8x32xf32>
    %143 = arith.subf %133, %142 : vector<8x32xf32>
    %144 = arith.mulf %143, %143 : vector<8x32xf32>
    %cst_69 = arith.constant dense<0.000000e+00> : vector<8xf32>
    %145 = vector.multi_reduction <add>, %144, %cst_69 [1] : vector<8x32xf32> to vector<8xf32>
    %146 = vector.shape_cast %145 : vector<8xf32> to vector<8x1xf32>
    %cst_70 = arith.constant 3.200000e+01 : f32
    %147 = vector.broadcast %cst_70 : f32 to vector<8x1xf32>
    %148 = arith.divf %146, %147 : vector<8x1xf32>
    %149 = vector.broadcast %141 : vector<8x1xf32> to vector<8x32xf32>
    %150 = arith.subf %133, %149 : vector<8x32xf32>
    %cst_71 = arith.constant 9.99999996E-13 : f32
    %151 = vector.broadcast %cst_71 : f32 to vector<8x1xf32>
    %152 = arith.addf %148, %151 : vector<8x1xf32>
    %153 = math.rsqrt %152 : vector<8x1xf32>
    %154 = vector.broadcast %153 : vector<8x1xf32> to vector<8x32xf32>
    %155 = arith.mulf %150, %154 : vector<8x32xf32>
    %156 = vector.broadcast %135 : vector<1x32xf32> to vector<8x32xf32>
    %157 = arith.mulf %155, %156 : vector<8x32xf32>
    %158 = vector.broadcast %137 : vector<1x32xf32> to vector<8x32xf32>
    %159 = arith.addf %157, %158 : vector<8x32xf32>
    %160 = arith.truncf %159 : vector<8x32xf32> to vector<8x32xbf16>
    %c0_72 = arith.constant 0 : index
    %c0_73 = arith.constant 0 : index
    %c0_74 = arith.constant 0 : index
    %161 = vector.load %arg16[%c0_72, %c0_73, %c0_74] : memref<1x32x128xbf16, #tpu.memory_space<vmem>>, vector<1x32x128xbf16>
    %162 = vector.shape_cast %161 : vector<1x32x128xbf16> to vector<32x128xbf16>
    %cst_75 = arith.constant dense<0.000000e+00> : vector<8x128xf32>
    %163 = tpu.matmul %160, %162, %cst_75 {dimension_numbers = #tpu.dot_dimension_numbers<[1], [0], [0], [1], [0, 0, 1, 1], [], []>} : vector<8x32xbf16>, vector<32x128xbf16>, vector<8x128xf32> -> vector<8x128xf32>
    %c0_76 = arith.constant 0 : index
    %c0_77 = arith.constant 0 : index
    %c0_78 = arith.constant 0 : index
    %164 = vector.load %arg17[%c0_76, %c0_77, %c0_78] : memref<1x1x128xf32, #tpu.memory_space<vmem>>, vector<1x1x128xf32>
    %165 = vector.shape_cast %164 : vector<1x1x128xf32> to vector<1x128xf32>
    %166 = vector.broadcast %165 : vector<1x128xf32> to vector<8x128xf32>
    %167 = arith.addf %163, %166 : vector<8x128xf32>
    %cst_79 = arith.constant 5.000000e-01 : f32
    %168 = vector.broadcast %cst_79 : f32 to vector<8x128xf32>
    %169 = arith.mulf %168, %167 : vector<8x128xf32>
    %cst_80 = arith.constant 4.471500e-02 : f32
    %170 = vector.broadcast %cst_80 : f32 to vector<8x128xf32>
    %171 = arith.mulf %170, %167 : vector<8x128xf32>
    %172 = arith.mulf %171, %167 : vector<8x128xf32>
    %173 = arith.mulf %172, %167 : vector<8x128xf32>
    %174 = arith.addf %167, %173 : vector<8x128xf32>
    %cst_81 = arith.constant 0.797884583 : f32
    %175 = vector.broadcast %cst_81 : f32 to vector<8x128xf32>
    %176 = arith.mulf %175, %174 : vector<8x128xf32>
    %177 = math.tanh %176 : vector<8x128xf32>
    %cst_82 = arith.constant 1.000000e+00 : f32
    %178 = vector.broadcast %cst_82 : f32 to vector<8x128xf32>
    %179 = arith.addf %178, %177 : vector<8x128xf32>
    %180 = arith.mulf %169, %179 : vector<8x128xf32>
    %181 = arith.truncf %180 : vector<8x128xf32> to vector<8x128xbf16>
    %c0_83 = arith.constant 0 : index
    %c0_84 = arith.constant 0 : index
    %c0_85 = arith.constant 0 : index
    %182 = vector.load %arg18[%c0_83, %c0_84, %c0_85] : memref<1x128x32xbf16, #tpu.memory_space<vmem>>, vector<1x128x32xbf16>
    %183 = vector.shape_cast %182 : vector<1x128x32xbf16> to vector<128x32xbf16>
    %cst_86 = arith.constant dense<0.000000e+00> : vector<8x32xf32>
    %184 = tpu.matmul %181, %183, %cst_86 {dimension_numbers = #tpu.dot_dimension_numbers<[1], [0], [0], [1], [0, 0, 1, 1], [], []>} : vector<8x128xbf16>, vector<128x32xbf16>, vector<8x32xf32> -> vector<8x32xf32>
    %c0_87 = arith.constant 0 : index
    %c0_88 = arith.constant 0 : index
    %c0_89 = arith.constant 0 : index
    %185 = vector.load %arg19[%c0_87, %c0_88, %c0_89] : memref<1x1x32xf32, #tpu.memory_space<vmem>>, vector<1x1x32xf32>
    %186 = vector.shape_cast %185 : vector<1x1x32xf32> to vector<1x32xf32>
    %187 = vector.broadcast %186 : vector<1x32xf32> to vector<8x32xf32>
    %188 = arith.addf %184, %187 : vector<8x32xf32>
    %189 = arith.addf %159, %188 : vector<8x32xf32>
    %c0_90 = arith.constant 0 : index
    %c0_91 = arith.constant 0 : index
    %c0_92 = arith.constant 0 : index
    %190 = vector.load %arg20[%c0_90, %c0_91, %c0_92] : memref<1x1x32xf32, #tpu.memory_space<vmem>>, vector<1x1x32xf32>
    %191 = vector.shape_cast %190 : vector<1x1x32xf32> to vector<1x32xf32>
    %c0_93 = arith.constant 0 : index
    %c0_94 = arith.constant 0 : index
    %c0_95 = arith.constant 0 : index
    %192 = vector.load %arg21[%c0_93, %c0_94, %c0_95] : memref<1x1x32xf32, #tpu.memory_space<vmem>>, vector<1x1x32xf32>
    %193 = vector.shape_cast %192 : vector<1x1x32xf32> to vector<1x32xf32>
    %cst_96 = arith.constant dense<0.000000e+00> : vector<8xf32>
    %194 = vector.multi_reduction <add>, %189, %cst_96 [1] : vector<8x32xf32> to vector<8xf32>
    %195 = vector.shape_cast %194 : vector<8xf32> to vector<8x1xf32>
    %cst_97 = arith.constant 3.200000e+01 : f32
    %196 = vector.broadcast %cst_97 : f32 to vector<8x1xf32>
    %197 = arith.divf %195, %196 : vector<8x1xf32>
    %198 = vector.broadcast %197 : vector<8x1xf32> to vector<8x32xf32>
    %199 = arith.subf %189, %198 : vector<8x32xf32>
    %200 = arith.mulf %199, %199 : vector<8x32xf32>
    %cst_98 = arith.constant dense<0.000000e+00> : vector<8xf32>
    %201 = vector.multi_reduction <add>, %200, %cst_98 [1] : vector<8x32xf32> to vector<8xf32>
    %202 = vector.shape_cast %201 : vector<8xf32> to vector<8x1xf32>
    %cst_99 = arith.constant 3.200000e+01 : f32
    %203 = vector.broadcast %cst_99 : f32 to vector<8x1xf32>
    %204 = arith.divf %202, %203 : vector<8x1xf32>
    %205 = vector.broadcast %197 : vector<8x1xf32> to vector<8x32xf32>
    %206 = arith.subf %189, %205 : vector<8x32xf32>
    %cst_100 = arith.constant 9.99999996E-13 : f32
    %207 = vector.broadcast %cst_100 : f32 to vector<8x1xf32>
    %208 = arith.addf %204, %207 : vector<8x1xf32>
    %209 = math.rsqrt %208 : vector<8x1xf32>
    %210 = vector.broadcast %209 : vector<8x1xf32> to vector<8x32xf32>
    %211 = arith.mulf %206, %210 : vector<8x32xf32>
    %212 = vector.broadcast %191 : vector<1x32xf32> to vector<8x32xf32>
    %213 = arith.mulf %211, %212 : vector<8x32xf32>
    %214 = vector.broadcast %193 : vector<1x32xf32> to vector<8x32xf32>
    %215 = arith.addf %213, %214 : vector<8x32xf32>
    %c0_101 = arith.constant 0 : index
    %c0_102 = arith.constant 0 : index
    %216 = vector.load %arg29[%c0_101, %c0_102] : memref<8x32xf32, #tpu.memory_space<vmem>>, vector<8x32xf32>
    tpu.vector_store %arg29[%c0_101, %c0_102], %215 {strides = array<i32>} : memref<8x32xf32, #tpu.memory_space<vmem>>, vector<8x32xf32>,
    %c0_103 = arith.constant 0 : index
    %c0_104 = arith.constant 0 : index
    %c0_105 = arith.constant 0 : index
    %c0_106 = arith.constant 0 : index
    %217 = vector.load %arg27[%c0_103, %c0_104, %c0_105, %c0_106] : memref<1x1x8x32xf32, #tpu.memory_space<vmem>>, vector<1x1x8x32xf32>
    %218 = vector.shape_cast %217 : vector<1x1x8x32xf32> to vector<8x32xf32>
    %219 = vector.shape_cast %215 : vector<8x32xf32> to vector<1x1x8x32xf32>
    tpu.vector_store %arg27[%c0_103, %c0_104, %c0_105, %c0_106], %219 {strides = array<i32>} : memref<1x1x8x32xf32, #tpu.memory_space<vmem>>, vector<1x1x8x32xf32>,
    %c1_i32 = arith.constant 1 : i32
    %220 = arith.cmpi eq, %arg1, %c1_i32 : i32
    %221 = arith.extui %220 : i1 to i32
    %c0_i32_107 = arith.constant 0 : i32
    %222 = arith.cmpi ne, %221, %c0_i32_107 : i32
    scf.if %222 {
      %223 = vector.extract_strided_slice %215 {offsets = [0, 0], sizes = [1, 32], strides = [1, 1]} : vector<8x32xf32> to vector<1x32xf32>
      %224 = arith.truncf %223 : vector<1x32xf32> to vector<1x32xbf16>
      %c0_108 = arith.constant 0 : index
      %c0_109 = arith.constant 0 : index
      %225 = vector.load %arg22[%c0_108, %c0_109] : memref<32x32xbf16, #tpu.memory_space<vmem>>, vector<32x32xbf16>
      %cst_110 = arith.constant dense<0.000000e+00> : vector<1x32xf32>
      %226 = tpu.matmul %224, %225, %cst_110 {dimension_numbers = #tpu.dot_dimension_numbers<[1], [0], [0], [1], [0, 0, 1, 1], [], []>} : vector<1x32xbf16>, vector<32x32xbf16>, vector<1x32xf32> -> vector<1x32xf32>
      %c0_111 = arith.constant 0 : index
      %c0_112 = arith.constant 0 : index
      %227 = vector.load %arg23[%c0_111, %c0_112] : memref<1x32xf32, #tpu.memory_space<vmem>>, vector<1x32xf32>
      %228 = arith.addf %226, %227 : vector<1x32xf32>
      %229 = math.tanh %228 : vector<1x32xf32>
      %230 = arith.truncf %229 : vector<1x32xf32> to vector<1x32xbf16>
      %c0_113 = arith.constant 0 : index
      %c0_114 = arith.constant 0 : index
      %231 = vector.load %arg24[%c0_113, %c0_114] : memref<32x128xbf16, #tpu.memory_space<vmem>>, vector<32x128xbf16>
      %cst_115 = arith.constant dense<0.000000e+00> : vector<1x128xf32>
      %232 = tpu.matmul %230, %231, %cst_115 {dimension_numbers = #tpu.dot_dimension_numbers<[1], [0], [0], [1], [0, 0, 1, 1], [], []>} : vector<1x32xbf16>, vector<32x128xbf16>, vector<1x128xf32> -> vector<1x128xf32>
      %c0_116 = arith.constant 0 : index
      %c0_117 = arith.constant 0 : index
      %233 = vector.load %arg25[%c0_116, %c0_117] : memref<1x128xf32, #tpu.memory_space<vmem>>, vector<1x128xf32>
      %234 = arith.addf %232, %233 : vector<1x128xf32>
      %c0_118 = arith.constant 0 : index
      %c0_119 = arith.constant 0 : index
      %c0_120 = arith.constant 0 : index
      %235 = vector.load %arg28[%c0_118, %c0_119, %c0_120] : memref<1x1x128xf32, #tpu.memory_space<vmem>>, vector<1x1x128xf32>
      %236 = vector.shape_cast %235 : vector<1x1x128xf32> to vector<1x128xf32>
      %237 = vector.shape_cast %234 : vector<1x128xf32> to vector<1x1x128xf32>
      tpu.vector_store %arg28[%c0_118, %c0_119, %c0_120], %237 {strides = array<i32>} : memref<1x1x128xf32, #tpu.memory_space<vmem>>, vector<1x1x128xf32>,
    } else {
    }
    return
  }
  func.func @transform_0(%arg0: i32, %arg1: i32) -> (i32, i32, i32) {
    %c0_i32 = arith.constant 0 : i32
    %c0_i32_0 = arith.constant 0 : i32
    %c0_i32_1 = arith.constant 0 : i32
    return %arg0, %c0_i32, %c0_i32_0 : i32, i32, i32
  }
  func.func @transform_1(%arg0: i32, %arg1: i32) -> (i32, i32, i32) {
    %c0_i32 = arith.constant 0 : i32
    %c0_i32_0 = arith.constant 0 : i32
    %c0_i32_1 = arith.constant 0 : i32
    return %arg0, %c0_i32, %c0_i32_0 : i32, i32, i32
  }
  func.func @transform_2(%arg0: i32, %arg1: i32) -> (i32, i32) {
    %c0_i32 = arith.constant 0 : i32
    %c0_i32_0 = arith.constant 0 : i32
    %c0_i32_1 = arith.constant 0 : i32
    return %c0_i32, %c0_i32_0 : i32, i32
  }
  func.func @transform_3(%arg0: i32, %arg1: i32) -> (i32, i32) {
    %c0_i32 = arith.constant 0 : i32
    %c0_i32_0 = arith.constant 0 : i32
    %c0_i32_1 = arith.constant 0 : i32
    return %c0_i32, %c0_i32_0 : i32, i32
  }
  func.func @transform_4(%arg0: i32, %arg1: i32) -> (i32, i32, i32) {
    %c0_i32 = arith.constant 0 : i32
    %c0_i32_0 = arith.constant 0 : i32
    %c0_i32_1 = arith.constant 0 : i32
    return %arg1, %c0_i32, %c0_i32_0 : i32, i32, i32
  }
  func.func @transform_5(%arg0: i32, %arg1: i32) -> (i32, i32, i32) {
    %c0_i32 = arith.constant 0 : i32
    %c0_i32_0 = arith.constant 0 : i32
    %c0_i32_1 = arith.constant 0 : i32
    return %arg1, %c0_i32, %c0_i32_0 : i32, i32, i32
  }
  func.func @transform_6(%arg0: i32, %arg1: i32) -> (i32, i32, i32) {
    %c0_i32 = arith.constant 0 : i32
    %c0_i32_0 = arith.constant 0 : i32
    %c0_i32_1 = arith.constant 0 : i32
    return %arg1, %c0_i32, %c0_i32_0 : i32, i32, i32
  }
  func.func @transform_7(%arg0: i32, %arg1: i32) -> (i32, i32, i32) {
    %c0_i32 = arith.constant 0 : i32
    %c0_i32_0 = arith.constant 0 : i32
    %c0_i32_1 = arith.constant 0 : i32
    return %arg1, %c0_i32, %c0_i32_0 : i32, i32, i32
  }
  func.func @transform_8(%arg0: i32, %arg1: i32) -> (i32, i32, i32) {
    %c0_i32 = arith.constant 0 : i32
    %c0_i32_0 = arith.constant 0 : i32
    %c0_i32_1 = arith.constant 0 : i32
    return %arg1, %c0_i32, %c0_i32_0 : i32, i32, i32
  }
  func.func @transform_9(%arg0: i32, %arg1: i32) -> (i32, i32, i32) {
    %c0_i32 = arith.constant 0 : i32
    %c0_i32_0 = arith.constant 0 : i32
    %c0_i32_1 = arith.constant 0 : i32
    return %arg1, %c0_i32, %c0_i32_0 : i32, i32, i32
  }
  func.func @transform_10(%arg0: i32, %arg1: i32) -> (i32, i32, i32) {
    %c0_i32 = arith.constant 0 : i32
    %c0_i32_0 = arith.constant 0 : i32
    %c0_i32_1 = arith.constant 0 : i32
    return %arg1, %c0_i32, %c0_i32_0 : i32, i32, i32
  }
  func.func @transform_11(%arg0: i32, %arg1: i32) -> (i32, i32, i32) {
    %c0_i32 = arith.constant 0 : i32
    %c0_i32_0 = arith.constant 0 : i32
    %c0_i32_1 = arith.constant 0 : i32
    return %arg1, %c0_i32, %c0_i32_0 : i32, i32, i32
  }
  func.func @transform_12(%arg0: i32, %arg1: i32) -> (i32, i32, i32) {
    %c0_i32 = arith.constant 0 : i32
    %c0_i32_0 = arith.constant 0 : i32
    %c0_i32_1 = arith.constant 0 : i32
    return %arg1, %c0_i32, %c0_i32_0 : i32, i32, i32
  }
  func.func @transform_13(%arg0: i32, %arg1: i32) -> (i32, i32, i32) {
    %c0_i32 = arith.constant 0 : i32
    %c0_i32_0 = arith.constant 0 : i32
    %c0_i32_1 = arith.constant 0 : i32
    return %arg1, %c0_i32, %c0_i32_0 : i32, i32, i32
  }
  func.func @transform_14(%arg0: i32, %arg1: i32) -> (i32, i32, i32) {
    %c0_i32 = arith.constant 0 : i32
    %c0_i32_0 = arith.constant 0 : i32
    %c0_i32_1 = arith.constant 0 : i32
    return %arg1, %c0_i32, %c0_i32_0 : i32, i32, i32
  }
  func.func @transform_15(%arg0: i32, %arg1: i32) -> (i32, i32, i32) {
    %c0_i32 = arith.constant 0 : i32
    %c0_i32_0 = arith.constant 0 : i32
    %c0_i32_1 = arith.constant 0 : i32
    return %arg1, %c0_i32, %c0_i32_0 : i32, i32, i32
  }
  func.func @transform_16(%arg0: i32, %arg1: i32) -> (i32, i32, i32) {
    %c0_i32 = arith.constant 0 : i32
    %c0_i32_0 = arith.constant 0 : i32
    %c0_i32_1 = arith.constant 0 : i32
    return %arg1, %c0_i32, %c0_i32_0 : i32, i32, i32
  }
  func.func @transform_17(%arg0: i32, %arg1: i32) -> (i32, i32, i32) {
    %c0_i32 = arith.constant 0 : i32
    %c0_i32_0 = arith.constant 0 : i32
    %c0_i32_1 = arith.constant 0 : i32
    return %arg1, %c0_i32, %c0_i32_0 : i32, i32, i32
  }
  func.func @transform_18(%arg0: i32, %arg1: i32) -> (i32, i32, i32) {
    %c0_i32 = arith.constant 0 : i32
    %c0_i32_0 = arith.constant 0 : i32
    %c0_i32_1 = arith.constant 0 : i32
    return %arg1, %c0_i32, %c0_i32_0 : i32, i32, i32
  }
  func.func @transform_19(%arg0: i32, %arg1: i32) -> (i32, i32, i32) {
    %c0_i32 = arith.constant 0 : i32
    %c0_i32_0 = arith.constant 0 : i32
    %c0_i32_1 = arith.constant 0 : i32
    return %arg1, %c0_i32, %c0_i32_0 : i32, i32, i32
  }
  func.func @transform_20(%arg0: i32, %arg1: i32) -> (i32, i32) {
    %c0_i32 = arith.constant 0 : i32
    %c0_i32_0 = arith.constant 0 : i32
    %c0_i32_1 = arith.constant 0 : i32
    return %c0_i32, %c0_i32_0 : i32, i32
  }
  func.func @transform_21(%arg0: i32, %arg1: i32) -> (i32, i32) {
    %c0_i32 = arith.constant 0 : i32
    %c0_i32_0 = arith.constant 0 : i32
    %c0_i32_1 = arith.constant 0 : i32
    return %c0_i32, %c0_i32_0 : i32, i32
  }
  func.func @transform_22(%arg0: i32, %arg1: i32) -> (i32, i32) {
    %c0_i32 = arith.constant 0 : i32
    %c0_i32_0 = arith.constant 0 : i32
    %c0_i32_1 = arith.constant 0 : i32
    return %c0_i32, %c0_i32_0 : i32, i32
  }
  func.func @transform_23(%arg0: i32, %arg1: i32) -> (i32, i32) {
    %c0_i32 = arith.constant 0 : i32
    %c0_i32_0 = arith.constant 0 : i32
    %c0_i32_1 = arith.constant 0 : i32
    return %c0_i32, %c0_i32_0 : i32, i32
  }
  func.func @transform_24(%arg0: i32, %arg1: i32) -> (i32, i32, i32) {
    %c0_i32 = arith.constant 0 : i32
    %c0_i32_0 = arith.constant 0 : i32
    %c0_i32_1 = arith.constant 0 : i32
    return %arg0, %c0_i32, %c0_i32_0 : i32, i32, i32
  }
  func.func @transform_25(%arg0: i32, %arg1: i32) -> (i32, i32, i32, i32) {
    %c0_i32 = arith.constant 0 : i32
    %c0_i32_0 = arith.constant 0 : i32
    %c0_i32_1 = arith.constant 0 : i32
    return %arg1, %arg0, %c0_i32, %c0_i32_0 : i32, i32, i32, i32
  }
  func.func @transform_26(%arg0: i32, %arg1: i32) -> (i32, i32, i32) {
    %c0_i32 = arith.constant 0 : i32
    %c0_i32_0 = arith.constant 0 : i32
    %c0_i32_1 = arith.constant 0 : i32
    return %arg0, %c0_i32, %c0_i32_0 : i32, i32, i32
  }
}

</mosaic_0001>

<bundles_post_ra>
// kernel: tpu_custom_call.1
= control target key start
LH: loop header
LB: loop body
LE: loop exit
PB: predicated region body
PF: predicated region fallthrough
CT: control target
= control target key end

     0   :  { %s5216_s0 = inlined_call_operand.hbm [shape: f32[2,8,32], index: 0, kind: input, shape index: {}]   ;;  %s5217_s1 = inlined_call_operand.hbm [shape: f32[2,1,8], index: 1, kind: input, shape index: {}]   ;;  %s5218_s2 = inlined_call_operand.hbm [shape: f32[1,32], index: 2, kind: input, shape index: {}]   ;;  %s5219_s3 = inlined_call_operand.hbm [shape: f32[1,32], index: 3, kind: input, shape index: {}]   ;;  %s5220_s4 = inlined_call_operand.vmem [shape: bf16[2,32,32], index: 4, kind: input, shape index: {}]   ;;  %s5221_s5 = inlined_call_operand.hbm [shape: f32[2,1,32], index: 5, kind: input, shape index: {}]   ;;  %s5222_s6 = inlined_call_operand.vmem [shape: bf16[2,32,32], index: 6, kind: input, shape index: {}]   ;;  %s5223_s7 = inlined_call_operand.hbm [shape: f32[2,1,32], index: 7, kind: input, shape index: {}]   ;;  %s5224_s8 = inlined_call_operand.vmem [shape: bf16[2,32,32], index: 8, kind: input, shape index: {}]   ;;  %s5225_s9 = inlined_call_operand.hbm [shape: f32[2,1,32], index: 9, kind: input, shape index: {}]   ;;  %s5226_s10 = inlined_call_operand.vmem [shape: bf16[2,32,32], index: 10, kind: input, shape index: {}]   ;;  %s5227_s11 = inlined_call_operand.hbm [shape: f32[2,1,32], index: 11, kind: input, shape index: {}]   ;;  %s5228_s12 = inlined_call_operand.hbm [shape: f32[2,1,32], index: 12, kind: input, shape index: {}]   ;;  %s5229_s13 = inlined_call_operand.hbm [shape: f32[2,1,32], index: 13, kind: input, shape index: {}]   ;;  %s5230_s14 = inlined_call_operand.vmem [shape: bf16[2,32,128], index: 14, kind: input, shape index: {}]   ;;  %s5231_s15 = inlined_call_operand.hbm [shape: f32[2,1,128], index: 15, kind: input, shape index: {}]   ;;  %s5232_s16 = inlined_call_operand.vmem [shape: bf16[2,128,32], index: 16, kind: input, shape index: {}]   ;;  %s5233_s17 = inlined_call_operand.hbm [shape: f32[2,1,32], index: 17, kind: input, shape index: {}]   ;;  %s5234_s18 = inlined_call_operand.vmem [shape: f32[2,1,32], index: 18, kind: input, shape index: {}]   ;;  %s5235_s19 = inlined_call_operand.vmem [shape: f32[2,1,32], index: 19, kind: input, shape index: {}]   ;;  %s5236_s20 = inlined_call_operand.vmem [shape: bf16[32,32], index: 20, kind: input, shape index: {}]   ;;  %s5237_s21 = inlined_call_operand.vmem [shape: f32[1,32], index: 21, kind: input, shape index: {}]   ;;  %s5238_s22 = inlined_call_operand.vmem [shape: bf16[32,128], index: 22, kind: input, shape index: {}]   ;;  %s5239_s23 = inlined_call_operand.vmem [shape: f32[1,128], index: 23, kind: input, shape index: {}]   ;;  %s5240_s24 = inlined_call_operand.hbm [shape: f32[2,8,32], index: 24, kind: output, shape index: {0}]   ;;  %s5241_s25 = inlined_call_operand.hbm [shape: f32[2,2,8,32], index: 25, kind: output, shape index: {1}]   ;;  %s5242_s26 = inlined_call_operand.hbm [shape: f32[2,1,128], index: 26, kind: output, shape index: {2}]  }
   0x1   :  { %5307 = sst [smem:[#allocation63_spill]] %s5216_s0 }
   0x2   :  { %5308 = sst [smem:[#allocation64_spill]] %s5217_s1 }
   0x3   :  { %5309 = sst [smem:[#allocation65_spill]] %s5218_s2 }
   0x4   :  { %5310 = sst [smem:[#allocation66_spill]] %s5219_s3 }
   0x5   :  { %5311 = sst [smem:[#allocation67_spill]] %s5220_s4 }
   0x6   :  { %5312 = sst [smem:[#allocation68_spill]] %s5221_s5 }
   0x7   :  { %5313 = sst [smem:[#allocation69_spill]] %s5222_s6 }
   0x8   :  { %5314 = sst [smem:[#allocation70_spill]] %s5223_s7 }
   0x9   :  { %5315 = sst [smem:[#allocation71_spill]] %s5224_s8 }
   0xa   :  { %5316 = sst [smem:[#allocation72_spill]] %s5225_s9 }
   0xb   :  { %5317 = sst [smem:[#allocation73_spill]] %s5226_s10 }
   0xc   :  { %5318 = sst [smem:[#allocation74_spill]] %s5227_s11 }
   0xd   :  { %5319 = sst [smem:[#allocation75_spill]] %s5228_s12 }
   0xe   :  { %5320 = sst [smem:[#allocation76_spill]] %s5229_s13 }
   0xf   :  { %5321 = sst [smem:[#allocation77_spill]] %s5230_s14 }
  0x10   :  { %5322 = sst [smem:[#allocation78_spill]] %s5231_s15 }
  0x11   :  { %5323 = sst [smem:[#allocation79_spill]] %s5232_s16 }
  0x12   :  { %5324 = sst [smem:[#allocation80_spill]] %s5233_s17 }
  0x13   :  { %5325 = sst [smem:[#allocation81_spill]] %s5234_s18 }
  0x14   :  { %5326 = sst [smem:[#allocation82_spill]] %s5235_s19 }
  0x15   :  { %5327 = sst [smem:[#allocation83_spill]] %s5236_s20 }
  0x16   :  { %5328 = sst [smem:[#allocation84_spill]] %s5237_s21 }
  0x17   :  { %5329 = sst [smem:[#allocation85_spill]] %s5238_s22 }
  0x18   :  { %5330 = sst [smem:[#allocation86_spill]] %s5239_s23 }
  0x19   :  { %5331 = sst [smem:[#allocation87_spill]] %s5240_s24 }
  0x1a   :  { %5332 = sst [smem:[#allocation88_spill]] %s5241_s25 }
  0x1b   :  { %5333 = sst [smem:[#allocation89_spill]] %s5242_s26 }
  0x1c   :  { %32 = vsyncpa [#allocation5], 0 }
  0x1d   :  { %34 = vsyncpa [#allocation5 + $0x1], 0 }
  0x1e   :  { %35 = vsyncpa [#allocation8], 0 }
  0x1f   :  { %37 = vsyncpa [#allocation8 + $0x1], 0 }
  0x20   :  { %38 = vsyncpa [#allocation11], 0 }
  0x21   :  { %39 = vsyncpa [#allocation6], 0 }
  0x22   :  { %41 = vsyncpa [#allocation6 + $0x1], 0 }
  0x23   :  { %42 = vsyncpa [#allocation22], 0 }
  0x24   :  { %44 = vsyncpa [#allocation22 + $0x1], 0  ;;  %s4210_s27 = smov 0   ;;  %s4212_s3 = smov 0  }
  0x25   :  { %s4214_s7 = smov 0   ;;  %s4216_s28 = smov 0  }
  0x26   :  { %s4218_s8 = smov 0   ;;  %s4220_s4 = smov 0  }
  0x27   :  { %s4222_s29 = smov 0   ;;  %s4224_s0 = smov 0  }
  0x28   :  { %s4226_s9 = smov 0   ;;  %s4228_s30 = smov 0  }
  0x29   :  { %s4230_s2 = smov 0   ;;  %s4232_s5 = smov 0  }
  0x2a   :  { %s4234_s10 = smov 0   ;;  %s4236_s6 = smov 0  }
  0x2b LB: > { %5334 = sst [smem:[#allocation39_spill]] %s4000_s3  ;;  %s4279_s1 = sadd.s32 4294967295, %s4048_s6   ;;  %s4048_s6 = sphi %s4236_s6, %s50_s6   ;;  %s4044_s10 = sphi %s4234_s10, %s5473_s10   ;;  %s4040_s5 = sphi %s4232_s5, %s5472_s5   ;;  %s4036_s2 = sphi %s4230_s2, %s5471_s2   ;;  %s4032_s30 = sphi %s4228_s30, %s5470_s30   ;;  %s4028_s9 = sphi %s4226_s9, %s5469_s9   ;;  %s4024_s0 = sphi %s4224_s0, %s5468_s0   ;;  %s4020_s29 = sphi %s4222_s29, %s5467_s29   ;;  %s4016_s4 = sphi %s4220_s4, %s5466_s4   ;;  %s4012_s8 = sphi %s4218_s8, %s5465_s8   ;;  %s4008_s28 = sphi %s4216_s28, %s5464_s28   ;;  %s4004_s7 = sphi %s4214_s7, %s5463_s7   ;;  %s4000_s3 = sphi %s4212_s3, %s5462_s3   ;;  %s3996_s27 = sphi %s4210_s27, %s5461_s27  }
  0x2c   : > { %5335 = sst [smem:[#allocation40_spill]] %s4004_s7  ;;  %p202_p0 = scmp.ne.s32.totalorder %s4012_s8, %s4008_s28 }
  0x2d   : > { %5336 = sst [smem:[#allocation41_spill]] %s4012_s8  ;;  %p5259_p1 = scmp.eq.s32.totalorder %s4279_s1, 0 }
  0x2e   : > { %5337 = sst [smem:[#allocation42_spill]] %s4016_s4  ;;  %p5258_p2 = scmp.eq.s32.totalorder %s4279_s1, 3 }
  0x2f   : > { %5338 = sst [smem:[#allocation43_spill]] %s4020_s29  ;;  %p701_p3 = scmp.ne.s32.totalorder %s4004_s7, %s4000_s3 }
  0x30   : > { %5339 = sst [smem:[#allocation44_spill]] %s4024_s0  ;;  %p4289_p4 = por %p202_p0, %p5259_p1 }
  0x31   : > { %5340 = sst [smem:[#allocation45_spill]] %s4028_s9  ;;  %p4297_p6 = por %p701_p3, %p5258_p2 }
  0x32   : > { %5341 = sst [smem:[#allocation46_spill]] %s4032_s30  ;;  %p2910_p7 = scmp.ge.s32.totalorder %s4048_s6, 1 }
  0x33   : > { %5342 = sst [smem:[#allocation47_spill]] %s4036_s2  ;;  %p741_p8 = scmp.lt.s32.totalorder %s4048_s6, 5 }
  0x34   : > { %5343 = sst [smem:[#allocation48_spill]] %s4040_s5  ;;  %s4050_s28 = smov [#allocation9]  }
  0x35   : > { %5344 = sst [smem:[#allocation49_spill]] %s4044_s10  ;;  %p4303_p9 = pnand %p2910_p7, %p741_p8 }
  0x36   : > { %5345 = sst [smem:[#allocation50_spill]] %s4048_s6  ;;  %s754_s26 = sshll.u32 %s4050_s28, 4  ;;  %s755_s26 = int_to_ptr.vmem [resolvable:$true] %s754_s26 }
  0x37   : > { %s5346_s24 = scalar_select %p4289_p4, 1, 0 }
  0x38   : > { %s5348_s25 = scalar_select %p4297_p6, 1, 0 }
  0x39   : > { %5347 = sst [smem:[#allocation51_spill]] %s5346_s24  ;;  %p3212_p10 = pneg %p4303_p9 }
  0x3a   : > { %5349 = sst [smem:[#allocation52_spill]] %s5348_s25  ;;  %s5352_s25 = sld [smem:[#allocation65_spill]] }
  0x3b   : > { %s5350_s2 = scalar_select %p4303_p9, 1, 0 }
  0x3c   : > { %p4311_p11 = pnand %p3212_p10, %p5259_p1 }
  0x3e   : > { %s5351_s23 = scalar_select %p4311_p11, 1, 0 }
  0x3f   : > { %p5269_p13 = pneg %p4311_p11 }
  0x40   : > { %s3438_s20 = scalar_lea.hbm %s5352_s25, 16 }
  0x41   : > { %p3439_p12 = scmp.ne.s32.totalorder %s5352_s25, %s3438_s20  ;;  %p3445_p7 = scmp.lt.u32.totalorder %s3438_s20, %s5352_s25 }
  0x43   : > { %p3441_p0 = pnand %p5269_p13, %p3439_p12 }
  0x45   : > { %p3442_p3 = pneg %p3441_p0 }
  0x47   : > { %p3447_p8 = pnand %p3445_p7, %p3442_p3 }
  0x49   : > { %3450 = shalt.err (!%p3447_p8)
}
  0x4a   : > { %s3451_s21 = scalar_lea.vmem %s755_s26, 16  ;;  %s3458_s18 = scalar_lea.vmem %s755_s26, 32 }
  0x4b   : > { %p3452_p10 = scmp.ne.s32.totalorder %s755_s26, %s3451_s21  ;;  %p3459_p1 = scmp.lt.s32.totalorder %s755_s26, %s755_s26 }
  0x4c   : > { %p3460_p6 = scmp.lt.s32.totalorder %s3458_s18, %s3451_s21 }
  0x4d   : > { %p3454_p5 = pnand %p3452_p10, %p5269_p13 }
  0x4e   : > { %p3461_p4 = por %p3460_p6, %p3459_p1 }
  0x4f   : > { %p3455_p2 = pneg %p3454_p5 }
  0x51   : > { %p3462_p9 = pnand %p3461_p4, %p3455_p2 }
  0x53   : > { %3465 = shalt.err (!%p3462_p9)
}
  0x54   : > { %3215 = dma.hbm_to_vmem [thread:$0]  (!%p4311_p11), %s5352_s25, 16, %s755_s26, [#allocation8]  }
  0x55   : > { %s59_s22 = sadd.s32 1, %s4040_s5  ;;  %s62_s28 = sadd.s32 1, %s4044_s10 }
  0x56   : > { %p60_p1 = scmp.ge.s32.totalorder %s59_s22, 2  ;;  %s69_s21 = sadd.s32 1, %s4028_s9 }
  0x57   : > { %p76_p2 = scmp.ne.s32.totalorder %s4028_s9, %s4024_s0  ;;  %p77_p4 = scmp.eq.s32.totalorder %s4048_s6, 0 }
  0x58   : > { %s5475_s22 = smov (%p60_p1, %s59_s22), 0  ;;  %s5477_s28 = smov (!%p60_p1, %s62_s28), %s4044_s10 }
  0x59   : > { %5353 = sst [smem:[#allocation53_spill]] %s5475_s22  ;;  %p82_p5 = scmp.ne.s32.totalorder %s4024_s0, %s4020_s29 }
  0x5a   : > { %p64_p6 = scmp.ge.s32.totalorder %s5477_s28, 2  ;;  %s186_s26 = ssub.s32 %s4040_s5, %s5475_s22 }
  0x5b   : > { %p4356_p9 = por %p77_p4, %p76_p2  ;;  %p5355_p12 = scmp.eq.s32.totalorder %s4279_s1, 0 }
  0x5c   : > { %s5479_s28 = smov (%p64_p6, %s5477_s28), 0  ;;  %p187_p3 = scmp.eq.s32.totalorder %s186_s26, 0 }
  0x5d   : > { %p4365_p0 = por %p5355_p12, %p82_p5  ;;  %5358 = sst [smem:[#allocation55_spill]] %s5479_s28 }
  0x5e   : > { %s189_s16 = sadd.s32 1, %s4016_s4  ;;  %s66_s20 = ssub.s32 %s4044_s10, %s5479_s28 }
  0x5f   : > { %s5356_s19 = scalar_select %p4365_p0, 1, 0 }
  0x60   : > { %p196_p7 = scmp.ne.s32.totalorder %s4016_s4, %s4012_s8  ;;  %p67_p8 = scmp.eq.s32.totalorder %s66_s20, 0 }
  0x61   : > { %5357 = sst [smem:[#allocation54_spill]] %s5356_s19  ;;  %p5359_p10 = scmp.eq.s32.totalorder %s4279_s1, 3 }
  0x62   : > { %s4386_s22 = scalar_select %p187_p3, %s4016_s4, %s189_s16  }
  0x63   : > { %p4381_p1 = por %p5359_p10, %p76_p2  ;;  %p4393_p6 = por %p196_p7, %p77_p4 }
  0x64   : > { %5362 = sst [smem:[#allocation57_spill]] %s4386_s22  ;;  %s5365_s28 = sadd.s32 4294967294, %s4048_s6  }
  0x65   : > { %s5360_s25 = scalar_select %p4381_p1, 1, 0 }
  0x66   : > { %s4389_s14 = scalar_select %p67_p8, %s4028_s9, %s69_s21  }
  0x67   : > { %5361 = sst [smem:[#allocation56_spill]] %s5360_s25  ;;  %p680_p12 = scmp.eq.s32.totalorder %s5365_s28, 3 }
  0x68   : > { %5363 = sst [smem:[#allocation58_spill]] %s4389_s14  ;;  %s688_s24 = sor.u32 %s186_s26, %s66_s20 }
  0x69   : > { %p3262_p2 = scmp.lt.s32.totalorder %s4048_s6, 4  ;;  %p4403_p10 = por %p680_p12, %p82_p5 }
  0x6a   : > { %p689_p3 = scmp.eq.s32.totalorder %s688_s24, 0  ;;  %p5368_p8 = scmp.ne.s32.totalorder %s4000_s3, %s3996_s27 }
  0x6b   : > { %s5366_s16 = scalar_select %p4403_p10, 1, 0 }
  0x6c   : > { %p4410_p13 = por %p5368_p8, %p680_p12  ;;  %s5279_s14 = sand.u32 1, %s4048_s6  }
  0x6d   : > { %5367 = sst [smem:[#allocation59_spill]] %s5366_s16  ;;  %s5371_s22 = sadd.s32 1, %s4004_s7 }
  0x6e   : > { %s5369_s21 = scalar_select %p4410_p13, 1, 0 }
  0x6f   : > { %s4418_s25 = scalar_select %p689_p3, %s4004_s7, %s5371_s22  }
  0x70   : > { %5370 = sst [smem:[#allocation60_spill]] %s5369_s21  ;;  %s5277_s28 = sand.u32 1, %s4028_s9  }
  0x71   : > { %5372 = sst [smem:[#allocation61_spill]] %s4418_s25  ;;  %s2914_s20 = sshll.u32 %s5277_s28, 3 }
  0x72   : > { %s2915_s26 = sshll.u32 %s4044_s10, 7  ;;  %s5373_s19 = sld [smem:[#allocation63_spill]] }
  0x73   : > { %s792_s24 = scalar_lea.vmem [#allocation4], %s2914_s20  ;;  %p4433_p4 = pnand %p3262_p2, %p4356_p9 }
  0x74   : > { %s799_s27 = sshll.u32 %s792_s24, 4  ;;  %p4443_p5 = pnand %p3262_p2, %p4393_p6  ;;  %s4437_s27 = int_to_ptr.vmem [resolvable:$true] %s799_s27 }
  0x75   : > { %s4449_s29 = scalar_lea.sflag [#allocation5], %s5279_s14  ;;  %p3468_p9 = pneg %p4433_p4 }
  0x76   : > { %s5375_s8 = scalar_select %p4443_p5, 1, 0 }
  0x78   : > { %s4427_s0 = scalar_lea.hbm %s5373_s19, %s2915_s26  ;;  %s3471_s30 = scalar_lea.hbm %s5373_s19, 256 }
  0x79   : > { %s3466_s20 = scalar_lea.hbm %s4427_s0, 128  ;;  %p3472_p6 = scmp.lt.u32.totalorder %s4427_s0, %s5373_s19 }
  0x7a   : > { %p3467_p7 = scmp.ne.s32.totalorder %s4427_s0, %s3466_s20  ;;  %p3473_p2 = scmp.lt.u32.totalorder %s3471_s30, %s3466_s20 }
  0x7b   : > { %p3475_p13 = scmp.lt.u32.totalorder %s3466_s20, %s4427_s0 }
  0x7c   : > { %p3469_p12 = pnand %p3468_p9, %p3467_p7  ;;  %p3474_p8 = por %p3473_p2, %p3472_p6 }
  0x7e   : > { %p3470_p3 = pneg %p3469_p12  ;;  %p3476_p10 = por %p3475_p13, %p3474_p8 }
  0x80   : > { %p3477_p1 = pnand %p3476_p10, %p3470_p3 }
  0x82   : > { %3480 = shalt.err (!%p3477_p1)
}
  0x83   : > { %s3481_s14 = scalar_lea.vmem %s4437_s27, 128  ;;  %s4051_s18 = smov [#allocation4]  }
  0x84   : > { %p3482_p7 = scmp.ne.s32.totalorder %s4437_s27, %s3481_s14  ;;  %s3486_s26 = sshll.u32 %s4051_s18, 4  ;;  %s3487_s26 = int_to_ptr.vmem [resolvable:$false] %s3486_s26 }
  0x85   : > { %s3488_s28 = scalar_lea.vmem %s3487_s26, 256  ;;  %p3489_p11 = scmp.lt.s32.totalorder %s4437_s27, %s3487_s26 }
  0x86   : > { %p3484_p12 = pnand %p3482_p7, %p3468_p9  ;;  %p3490_p6 = scmp.lt.s32.totalorder %s3488_s28, %s3481_s14 }
  0x88   : > { %p3485_p0 = pneg %p3484_p12  ;;  %p3491_p2 = por %p3490_p6, %p3489_p11 }
  0x8a   : > { %p3492_p13 = pnand %p3491_p2, %p3485_p0 }
  0x8c   : > { %3495 = shalt.err (!%p3492_p13)
}
  0x8d   : > { %3222 = dma.hbm_to_vmem [thread:$0]  (!%p4433_p4), %s4427_s0, 128, %s4437_s27, %s4449_s29  }
  0x8e   : > { %s2916_s20 = sshll.u32 %s4044_s10, 4  ;;  %s5376_s30 = sand.u32 1, %s4028_s9  }
  0x8f   : > { %s809_s24 = scalar_lea.vmem [#allocation7], %s5376_s30  ;;  %s5377_s14 = sld [smem:[#allocation64_spill]] }
  0x90   : > { %s816_s18 = sshll.u32 %s809_s24, 4  ;;  %s5378_s25 = sand.u32 1, %s4048_s6   ;;  %s817_s18 = int_to_ptr.vmem [resolvable:$true] %s816_s18 }
  0x91   : > { %s4487_s7 = scalar_lea.sflag [#allocation8], %s5378_s25 }
  0x95   : > { %s4483_s28 = scalar_lea.hbm %s5377_s14, %s2916_s20  ;;  %s3501_s19 = scalar_lea.hbm %s5377_s14, 32 }
  0x96   : > { %s3496_s21 = scalar_lea.hbm %s4483_s28, 16  ;;  %p3502_p10 = scmp.lt.u32.totalorder %s4483_s28, %s5377_s14 }
  0x97   : > { %p3497_p11 = scmp.ne.s32.totalorder %s4483_s28, %s3496_s21  ;;  %p3503_p3 = scmp.lt.u32.totalorder %s3501_s19, %s3496_s21 }
  0x98   : > { %p3505_p7 = scmp.lt.u32.totalorder %s3496_s21, %s4483_s28 }
  0x99   : > { %p3499_p0 = pnand %p3497_p11, %p3468_p9  ;;  %p3504_p8 = por %p3503_p3, %p3502_p10 }
  0x9b   : > { %p3500_p1 = pneg %p3499_p0  ;;  %p3506_p12 = por %p3505_p7, %p3504_p8 }
  0x9d   : > { %p3507_p6 = pnand %p3506_p12, %p3500_p1 }
  0x9f   : > { %3510 = shalt.err (!%p3507_p6)
}
  0xa0   : > { %s3511_s25 = scalar_lea.vmem %s817_s18, 16  ;;  %s4052_s24 = smov [#allocation7]  }
  0xa1   : > { %p3512_p2 = scmp.ne.s32.totalorder %s817_s18, %s3511_s25  ;;  %s3516_s26 = sshll.u32 %s4052_s24, 4  ;;  %s3517_s26 = int_to_ptr.vmem [resolvable:$false] %s3516_s26 }
  0xa2   : > { %s3518_s0 = scalar_lea.vmem %s3517_s26, 32  ;;  %p3519_p0 = scmp.lt.s32.totalorder %s817_s18, %s3517_s26 }
  0xa3   : > { %p3514_p13 = pnand %p3512_p2, %p3468_p9  ;;  %p3520_p5 = scmp.lt.s32.totalorder %s3518_s0, %s3511_s25 }
  0xa5   : > { %p3515_p11 = pneg %p3514_p13  ;;  %p3521_p3 = por %p3520_p5, %p3519_p0 }
  0xa7   : > { %p3522_p10 = pnand %p3521_p3, %p3515_p11 }
  0xa9   : > { %3525 = shalt.err (!%p3522_p10)
}
  0xaa   : > { %3225 = dma.hbm_to_vmem [thread:$0]  (!%p4433_p4), %s4483_s28, 16, %s817_s18, %s4487_s7  }
  0xab   : > { %s4510_s21 = sand.u32 1, %s4016_s4   ;;  %s4513_s27 = sshll.u32 %s4040_s5, 4 }
  0xac   : > { %s5379_s30 = sld [smem:[#allocation68_spill]]  ;;  %s834_s22 = scalar_lea.vmem [#allocation12], %s4510_s21 }
  0xad   : > { %s841_s26 = sshll.u32 %s834_s22, 4  ;;  %s5381_s0 = sld [smem:[#allocation70_spill]]  ;;  %s4522_s26 = int_to_ptr.vmem [resolvable:$true] %s841_s26 }
  0xae   : > { %p5383_p5 = scmp.ne.s32.totalorder %s5375_s8, 0 }
  0xb0   : > { %p4534_p9 = pneg %p5383_p5 }
  0xb2   : > { %s5380_s25 = smov %s5379_s30  ;;  %s4519_s24 = scalar_lea.hbm %s5379_s30, %s4513_s27 }
  0xb3   : > { %s5382_s14 = smov %s5381_s0  ;;  %s4528_s10 = scalar_lea.hbm %s5381_s0, %s4513_s27 }
  0xb4   : > { %s3526_s5 = scalar_lea.hbm %s4519_s24, 16  ;;  %s3531_s22 = scalar_lea.hbm %s5380_s25, 32 }
  0xb5   : > { %p3527_p4 = scmp.ne.s32.totalorder %s4519_s24, %s3526_s5  ;;  %p3532_p7 = scmp.lt.u32.totalorder %s4519_s24, %s5380_s25 }
  0xb6   : > { %s5384_s19 = scalar_select %p4534_p9, 1, 0 }
  0xb7   : > { %p3529_p1 = pnand %p4534_p9, %p3527_p4  ;;  %p3533_p12 = scmp.lt.u32.totalorder %s3531_s22, %s3526_s5 }
  0xb8   : > { %p3535_p2 = scmp.lt.u32.totalorder %s3526_s5, %s4519_s24 }
  0xb9   : > { %p3530_p8 = pneg %p3529_p1  ;;  %p3534_p6 = por %p3533_p12, %p3532_p7 }
  0xbb   : > { %p3536_p13 = por %p3535_p2, %p3534_p6 }
  0xbd   : > { %p3537_p11 = pnand %p3536_p13, %p3530_p8 }
  0xbf   : > { %3540 = shalt.err (!%p3537_p11)
}
  0xc0   : > { %s3541_s18 = scalar_lea.vmem %s4522_s26, 16  ;;  %s4053_s28 = smov [#allocation12]  }
  0xc1   : > { %p3542_p0 = scmp.ne.s32.totalorder %s4522_s26, %s3541_s18  ;;  %s3546_s0 = sshll.u32 %s4053_s28, 4  ;;  %s3547_s0 = int_to_ptr.vmem [resolvable:$false] %s3546_s0 }
  0xc2   : > { %s3548_s4 = scalar_lea.vmem %s3547_s0, 32  ;;  %p3549_p4 = scmp.lt.s32.totalorder %s4522_s26, %s3547_s0 }
  0xc3   : > { %p3544_p3 = pnand %p3542_p0, %p4534_p9  ;;  %p3550_p1 = scmp.lt.s32.totalorder %s3548_s4, %s3541_s18 }
  0xc5   : > { %p3545_p10 = pneg %p3544_p3  ;;  %p3551_p7 = por %p3550_p1, %p3549_p4 }
  0xc7   : > { %p3552_p12 = pnand %p3551_p7, %p3545_p10 }
  0xc9   : > { %3555 = shalt.err (!%p3552_p12)
}
  0xca   : > { %3228 = dma.hbm_to_vmem [thread:$0]  (!%p5383_p5), %s4519_s24, 16, %s4522_s26, %s4449_s29  }
  0xcb   : > { %s859_s9 = scalar_lea.vmem [#allocation13], %s4510_s21  ;;  %s5385_s22 = sld [smem:[#allocation72_spill]] }
  0xcc   : > { %s866_s5 = sshll.u32 %s859_s9, 4  ;;  %s3556_s28 = scalar_lea.hbm %s4528_s10, 16  ;;  %s867_s5 = int_to_ptr.vmem [resolvable:$true] %s866_s5 }
  0xcd   : > { %p3557_p8 = scmp.ne.s32.totalorder %s4528_s10, %s3556_s28  ;;  %s3561_s25 = scalar_lea.hbm %s5382_s14, 32 }
  0xce   : > { %p3562_p13 = scmp.lt.u32.totalorder %s4528_s10, %s5382_s14  ;;  %p3563_p11 = scmp.lt.u32.totalorder %s3561_s25, %s3556_s28 }
  0xcf   : > { %p3559_p6 = pnand %p3557_p8, %p4534_p9  ;;  %p3565_p3 = scmp.lt.u32.totalorder %s3556_s28, %s4528_s10 }
  0xd0   : > { %p3564_p0 = por %p3563_p11, %p3562_p13 }
  0xd1   : > { %s4563_s18 = scalar_lea.hbm %s5385_s22, %s4513_s27  ;;  %p3560_p2 = pneg %p3559_p6 }
  0xd2   : > { %p3566_p10 = por %p3565_p3, %p3564_p0 }
  0xd4   : > { %p3567_p4 = pnand %p3566_p10, %p3560_p2 }
  0xd6   : > { %3570 = shalt.err (!%p3567_p4)
}
  0xd7   : > { %s3571_s24 = scalar_lea.vmem %s867_s5, 16  ;;  %s4054_s26 = smov [#allocation13]  }
  0xd8   : > { %p3572_p1 = scmp.ne.s32.totalorder %s867_s5, %s3571_s24  ;;  %s3576_s9 = sshll.u32 %s4054_s26, 4  ;;  %s3577_s9 = int_to_ptr.vmem [resolvable:$false] %s3576_s9 }
  0xd9   : > { %s3578_s20 = scalar_lea.vmem %s3577_s9, 32  ;;  %p3579_p8 = scmp.lt.s32.totalorder %s867_s5, %s3577_s9 }
  0xda   : > { %p3574_p7 = pnand %p3572_p1, %p4534_p9  ;;  %p3580_p6 = scmp.lt.s32.totalorder %s3578_s20, %s3571_s24 }
  0xdc   : > { %p3575_p12 = pneg %p3574_p7  ;;  %p3581_p5 = por %p3580_p6, %p3579_p8 }
  0xde   : > { %p3582_p11 = pnand %p3581_p5, %p3575_p12 }
  0xe0   : > { %3585 = shalt.err (!%p3582_p11)
}
  0xe1   : > { %p5386_p13 = scmp.ne.s32.totalorder %s5375_s8, 0  ;;  %s884_s6 = scalar_lea.vmem [#allocation14], %s4510_s21 }
  0xe2   : > { %s891_s16 = sshll.u32 %s884_s6, 4  ;;  %s5387_s11 = sld [smem:[#allocation74_spill]]  ;;  %s892_s16 = int_to_ptr.vmem [resolvable:$true] %s891_s16 }
  0xe3   : > { %3231 = dma.hbm_to_vmem [thread:$0]  (!%p5386_p13), %s4528_s10, 16, %s867_s5, %s4487_s7  }
  0xe4   : > { %s3586_s0 = scalar_lea.hbm %s4563_s18, 16  ;;  %s3591_s26 = scalar_lea.hbm %s5385_s22, 32 }
  0xe5   : > { %p3587_p5 = scmp.ne.s32.totalorder %s4563_s18, %s3586_s0  ;;  %p3592_p3 = scmp.lt.u32.totalorder %s4563_s18, %s5385_s22 }
  0xe6   : > { %p3593_p10 = scmp.lt.u32.totalorder %s3591_s26, %s3586_s0  ;;  %p3595_p1 = scmp.lt.u32.totalorder %s3586_s0, %s4563_s18 }
  0xe7   : > { %p3589_p2 = pnand %p3587_p5, %p4534_p9 }
  0xe8   : > { %s4588_s28 = scalar_lea.hbm %s5387_s11, %s4513_s27  ;;  %p3594_p4 = por %p3593_p10, %p3592_p3 }
  0xe9   : > { %p3590_p0 = pneg %p3589_p2 }
  0xea   : > { %p3596_p7 = por %p3595_p1, %p3594_p4 }
  0xec   : > { %p3597_p12 = pnand %p3596_p7, %p3590_p0 }
  0xee   : > { %3600 = shalt.err (!%p3597_p12)
}
  0xef   : > { %s3601_s10 = scalar_lea.vmem %s892_s16, 16  ;;  %s4055_s5 = smov [#allocation14]  }
  0xf0   : > { %p3602_p8 = scmp.ne.s32.totalorder %s892_s16, %s3601_s10  ;;  %s3606_s6 = sshll.u32 %s4055_s5, 4  ;;  %s3607_s6 = int_to_ptr.vmem [resolvable:$false] %s3606_s6 }
  0xf1   : > { %s3608_s25 = scalar_lea.vmem %s3607_s6, 32  ;;  %p3609_p5 = scmp.lt.s32.totalorder %s892_s16, %s3607_s6 }
  0xf2   : > { %p3604_p6 = pnand %p3602_p8, %p4534_p9  ;;  %p3610_p2 = scmp.lt.s32.totalorder %s3608_s25, %s3601_s10 }
  0xf4   : > { %p3605_p11 = pneg %p3604_p6  ;;  %p3611_p13 = por %p3610_p2, %p3609_p5 }
  0xf6   : > { %p3612_p3 = pnand %p3611_p13, %p3605_p11 }
  0xf8   : > { %3615 = shalt.err (!%p3612_p3)
}
  0xf9   : > { %p5388_p10 = scmp.ne.s32.totalorder %s5375_s8, 0  ;;  %s909_s30 = scalar_lea.vmem [#allocation15], %s4510_s21 }
  0xfa   : > { %s916_s0 = sshll.u32 %s909_s30, 4  ;;  %s5389_s12 = sld [smem:[#allocation75_spill]]  ;;  %s917_s0 = int_to_ptr.vmem [resolvable:$true] %s916_s0 }
  0xfb   : > { %3234 = dma.hbm_to_vmem [thread:$0]  (!%p5388_p10), %s4563_s18, 16, %s892_s16, %s4449_s29  }
  0xfc   : > { %s3616_s9 = scalar_lea.hbm %s4588_s28, 16  ;;  %s3621_s5 = scalar_lea.hbm %s5387_s11, 32 }
  0xfd   : > { %p3617_p13 = scmp.ne.s32.totalorder %s4588_s28, %s3616_s9  ;;  %p3622_p1 = scmp.lt.u32.totalorder %s4588_s28, %s5387_s11 }
  0xfe   : > { %p3623_p7 = scmp.lt.u32.totalorder %s3621_s5, %s3616_s9  ;;  %p3625_p8 = scmp.lt.u32.totalorder %s3616_s9, %s4588_s28 }
  0xff   : > { %p3619_p0 = pnand %p3617_p13, %p4534_p9 }
 0x100   : > { %s4613_s26 = scalar_lea.hbm %s5389_s12, %s4513_s27  ;;  %p3624_p12 = por %p3623_p7, %p3622_p1 }
 0x101   : > { %p3620_p4 = pneg %p3619_p0 }
 0x102   : > { %p3626_p6 = por %p3625_p8, %p3624_p12 }
 0x104   : > { %p3627_p11 = pnand %p3626_p6, %p3620_p4 }
 0x106   : > { %3630 = shalt.err (!%p3627_p11)
}
 0x107   : > { %s3631_s18 = scalar_lea.vmem %s917_s0, 16  ;;  %s4056_s16 = smov [#allocation15]  }
 0x108   : > { %p3632_p5 = scmp.ne.s32.totalorder %s917_s0, %s3631_s18  ;;  %s3636_s30 = sshll.u32 %s4056_s16, 4  ;;  %s3637_s30 = int_to_ptr.vmem [resolvable:$false] %s3636_s30 }
 0x109   : > { %s3638_s4 = scalar_lea.vmem %s3637_s30, 32  ;;  %p3639_p13 = scmp.lt.s32.totalorder %s917_s0, %s3637_s30 }
 0x10a   : > { %p3634_p2 = pnand %p3632_p5, %p4534_p9  ;;  %p3640_p0 = scmp.lt.s32.totalorder %s3638_s4, %s3631_s18 }
 0x10c   : > { %p3635_p3 = pneg %p3634_p2  ;;  %p3641_p10 = por %p3640_p0, %p3639_p13 }
 0x10e   : > { %p3642_p1 = pnand %p3641_p10, %p3635_p3 }
 0x110   : > { %3645 = shalt.err (!%p3642_p1)
}
 0x111   : > { %p5390_p7 = scmp.ne.s32.totalorder %s5375_s8, 0  ;;  %s926_s24 = scalar_lea.vmem [#allocation16], %s4510_s21 }
 0x112   : > { %s933_s9 = sshll.u32 %s926_s24, 4  ;;  %s5391_s13 = sld [smem:[#allocation76_spill]]  ;;  %s934_s9 = int_to_ptr.vmem [resolvable:$true] %s933_s9 }
 0x113   : > { %3237 = dma.hbm_to_vmem [thread:$0]  (!%p5390_p7), %s4588_s28, 16, %s917_s0, %s4487_s7  }
 0x114   : > { %s3646_s6 = scalar_lea.hbm %s4613_s26, 16  ;;  %s3651_s16 = scalar_lea.hbm %s5389_s12, 32 }
 0x115   : > { %p3647_p10 = scmp.ne.s32.totalorder %s4613_s26, %s3646_s6  ;;  %p3652_p8 = scmp.lt.u32.totalorder %s4613_s26, %s5389_s12 }
 0x116   : > { %p3653_p6 = scmp.lt.u32.totalorder %s3651_s16, %s3646_s6  ;;  %p3655_p5 = scmp.lt.u32.totalorder %s3646_s6, %s4613_s26 }
 0x117   : > { %p3649_p4 = pnand %p3647_p10, %p4534_p9 }
 0x118   : > { %s4638_s5 = scalar_lea.hbm %s5391_s13, %s4513_s27  ;;  %p3654_p11 = por %p3653_p6, %p3652_p8 }
 0x119   : > { %p3650_p12 = pneg %p3649_p4 }
 0x11a   : > { %p3656_p2 = por %p3655_p5, %p3654_p11 }
 0x11c   : > { %p3657_p3 = pnand %p3656_p2, %p3650_p12 }
 0x11e   : > { %3660 = shalt.err (!%p3657_p3)
}
 0x11f   : > { %s3661_s28 = scalar_lea.vmem %s934_s9, 16  ;;  %s4057_s0 = smov [#allocation16]  }
 0x120   : > { %p3662_p13 = scmp.ne.s32.totalorder %s934_s9, %s3661_s28  ;;  %s3666_s24 = sshll.u32 %s4057_s0, 4  ;;  %s3667_s24 = int_to_ptr.vmem [resolvable:$false] %s3666_s24 }
 0x121   : > { %s3668_s20 = scalar_lea.vmem %s3667_s24, 32  ;;  %p3669_p10 = scmp.lt.s32.totalorder %s934_s9, %s3667_s24 }
 0x122   : > { %p3664_p0 = pnand %p3662_p13, %p4534_p9  ;;  %p3670_p4 = scmp.lt.s32.totalorder %s3668_s20, %s3661_s28 }
 0x124   : > { %p3665_p1 = pneg %p3664_p0  ;;  %p3671_p7 = por %p3670_p4, %p3669_p10 }
 0x126   : > { %p3672_p6 = pnand %p3671_p7, %p3665_p1 }
 0x128   : > { %3675 = shalt.err (!%p3672_p6)
}
 0x129   : > { %p5392_p8 = scmp.ne.s32.totalorder %s5375_s8, 0  ;;  %s943_s10 = scalar_lea.vmem [#allocation17], %s4510_s21 }
 0x12a   : > { %s950_s6 = sshll.u32 %s943_s10, 4  ;;  %s4058_s25 = smov [#allocation10]   ;;  %s4659_s6 = int_to_ptr.vmem [resolvable:$true] %s950_s6 }
 0x12b   : > { %3240 = dma.hbm_to_vmem [thread:$0]  (!%p5392_p8), %s4613_s26, 16, %s934_s9, %s4449_s29  }
 0x12c   : > { %s765_s18 = sshll.u32 %s4058_s25, 4  ;;  %s3676_s16 = scalar_lea.hbm %s4638_s5, 16  ;;  %s766_s18 = int_to_ptr.vmem [resolvable:$true] %s765_s18 }
 0x12d   : > { %p3677_p7 = scmp.ne.s32.totalorder %s4638_s5, %s3676_s16  ;;  %s3681_s28 = scalar_lea.hbm %s5391_s13, 32 }
 0x12e   : > { %p3682_p5 = scmp.lt.u32.totalorder %s4638_s5, %s5391_s13  ;;  %p3683_p2 = scmp.lt.u32.totalorder %s3681_s28, %s3676_s16 }
 0x12f   : > { %p3679_p12 = pnand %p3677_p7, %p4534_p9  ;;  %p3685_p13 = scmp.lt.u32.totalorder %s3676_s16, %s4638_s5 }
 0x130   : > { %p3684_p3 = por %p3683_p2, %p3682_p5 }
 0x131   : > { %p3680_p11 = pneg %p3679_p12 }
 0x132   : > { %p3686_p0 = por %p3685_p13, %p3684_p3 }
 0x134   : > { %p3687_p1 = pnand %p3686_p0, %p3680_p11 }
 0x136   : > { %3690 = shalt.err (!%p3687_p1)
}
 0x137   : > { %s3691_s26 = scalar_lea.vmem %s4659_s6, 16  ;;  %s4059_s9 = smov [#allocation17]  }
 0x138   : > { %p3692_p10 = scmp.ne.s32.totalorder %s4659_s6, %s3691_s26  ;;  %s3696_s20 = sshll.u32 %s4059_s9, 4  ;;  %s3697_s20 = int_to_ptr.vmem [resolvable:$false] %s3696_s20 }
 0x139   : > { %s3698_s10 = scalar_lea.vmem %s3697_s20, 32  ;;  %p3699_p7 = scmp.lt.s32.totalorder %s4659_s6, %s3697_s20 }
 0x13a   : > { %p3694_p4 = pnand %p3692_p10, %p4534_p9  ;;  %p3700_p12 = scmp.lt.s32.totalorder %s3698_s10, %s3691_s26 }
 0x13c   : > { %p3695_p6 = pneg %p3694_p4  ;;  %p3701_p5 = por %p3700_p12, %p3699_p7 }
 0x13e   : > { %p3702_p2 = pnand %p3701_p5, %p3695_p6 }
 0x140   : > { %3705 = shalt.err (!%p3702_p2)
}
 0x141   : > { %3243 = dma.hbm_to_vmem [thread:$0]  (!%p5392_p8), %s4638_s5, 16, %s4659_s6, %s4487_s7  }
 0x142   : > { %s5393_s30 = sld [smem:[#allocation66_spill]]  ;;  %p5395_p3 = scmp.ne.s32.totalorder %s5351_s23, 0 }
 0x144   : > { %p5396_p13 = pneg %p5395_p3 }
 0x148   : > { %s5394_s24 = smov %s5393_s30  ;;  %s3706_s4 = scalar_lea.hbm %s5393_s30, 16 }
 0x149   : > { %p3707_p11 = scmp.ne.s32.totalorder %s5394_s24, %s3706_s4  ;;  %p3713_p10 = scmp.lt.u32.totalorder %s3706_s4, %s5394_s24 }
 0x14b   : > { %p3709_p0 = pnand %p3707_p11, %p5396_p13 }
 0x14d   : > { %p3710_p1 = pneg %p3709_p0 }
 0x14f   : > { %p3715_p4 = pnand %p3713_p10, %p3710_p1 }
 0x151   : > { %3718 = shalt.err (!%p3715_p4)
}
 0x152   : > { %s3719_s5 = scalar_lea.vmem %s766_s18, 16  ;;  %p5397_p7 = pmov %p5396_p13 }
 0x153   : > { %p3720_p6 = scmp.ne.s32.totalorder %s766_s18, %s3719_s5  ;;  %s3726_s6 = scalar_lea.vmem %s766_s18, 32 }
 0x154   : > { %p3727_p2 = scmp.lt.s32.totalorder %s766_s18, %s766_s18  ;;  %p3728_p8 = scmp.lt.s32.totalorder %s3726_s6, %s3719_s5 }
 0x155   : > { %p3722_p12 = pnand %p3720_p6, %p5397_p7 }
 0x156   : > { %p3729_p9 = por %p3728_p8, %p3727_p2 }
 0x157   : > { %p3723_p5 = pneg %p3722_p12 }
 0x159   : > { %p3730_p11 = pnand %p3729_p9, %p3723_p5 }
 0x15b   : > { %3733 = shalt.err (!%p3730_p11)
}
 0x15c   : > { %3218 = dma.hbm_to_vmem [thread:$0]  (!%p5395_p3), %s5394_s24, 16, %s766_s18, [#allocation11]  }
 0x15d   : > { %s5398_s15 = sld [smem:[#allocation78_spill]]  ;;  %s968_s4 = scalar_lea.vmem [#allocation18], %s4510_s21 }
 0x15e   : > { %s975_s28 = sshll.u32 %s968_s4, 4  ;;  %p5399_p8 = scmp.ne.s32.totalorder %s5384_s19, 0  ;;  %s976_s28 = int_to_ptr.vmem [resolvable:$true] %s975_s28 }
 0x163   : > { %s4707_s30 = scalar_lea.hbm %s5398_s15, %s4513_s27  ;;  %s3739_s18 = scalar_lea.hbm %s5398_s15, 32 }
 0x164   : > { %s3734_s23 = scalar_lea.hbm %s4707_s30, 16  ;;  %p3740_p3 = scmp.lt.u32.totalorder %s4707_s30, %s5398_s15 }
 0x165   : > { %p3735_p9 = scmp.ne.s32.totalorder %s4707_s30, %s3734_s23  ;;  %p3741_p1 = scmp.lt.u32.totalorder %s3739_s18, %s3734_s23 }
 0x166   : > { %p3743_p4 = scmp.lt.u32.totalorder %s3734_s23, %s4707_s30 }
 0x167   : > { %p3737_p13 = pnand %p3735_p9, %p5399_p8  ;;  %p3742_p10 = por %p3741_p1, %p3740_p3 }
 0x169   : > { %p3738_p0 = pneg %p3737_p13  ;;  %p3744_p6 = por %p3743_p4, %p3742_p10 }
 0x16b   : > { %p3745_p7 = pnand %p3744_p6, %p3738_p0 }
 0x16d   : > { %3748 = shalt.err (!%p3745_p7)
}
 0x16e   : > { %s3749_s6 = scalar_lea.vmem %s976_s28, 16  ;;  %s4060_s20 = smov [#allocation18]  }
 0x16f   : > { %p3750_p12 = scmp.ne.s32.totalorder %s976_s28, %s3749_s6  ;;  %s3754_s10 = sshll.u32 %s4060_s20, 4  ;;  %s3755_s10 = int_to_ptr.vmem [resolvable:$false] %s3754_s10 }
 0x170   : > { %s3756_s25 = scalar_lea.vmem %s3755_s10, 32  ;;  %p3757_p11 = scmp.lt.s32.totalorder %s976_s28, %s3755_s10 }
 0x171   : > { %p3752_p5 = pnand %p3750_p12, %p5399_p8  ;;  %p3758_p9 = scmp.lt.s32.totalorder %s3756_s25, %s3749_s6 }
 0x173   : > { %p3753_p2 = pneg %p3752_p5  ;;  %p3759_p13 = por %p3758_p9, %p3757_p11 }
 0x175   : > { %p3760_p1 = pnand %p3759_p13, %p3753_p2 }
 0x177   : > { %3763 = shalt.err (!%p3760_p1)
}
 0x178   : > { %p5400_p3 = scmp.ne.s32.totalorder %s5375_s8, 0  ;;  %s5401_s17 = sld [smem:[#allocation80_spill]] }
 0x179   : > { %s993_s0 = scalar_lea.vmem [#allocation19], %s4510_s21 }
 0x17a   : > { %3246 = dma.hbm_to_vmem [thread:$0]  (!%p5400_p3), %s4707_s30, 16, %s976_s28, %s4449_s29  }
 0x17b   : > { %s1000_s26 = sshll.u32 %s993_s0, 4  ;;  %s1001_s26 = int_to_ptr.vmem [resolvable:$true] %s1000_s26 }
 0x17e   : > { %s4732_s23 = scalar_lea.hbm %s5401_s17, %s4513_s27  ;;  %s3769_s29 = scalar_lea.hbm %s5401_s17, 32 }
 0x17f   : > { %s3764_s18 = scalar_lea.hbm %s4732_s23, 16  ;;  %p3770_p6 = scmp.lt.u32.totalorder %s4732_s23, %s5401_s17 }
 0x180   : > { %p3765_p0 = scmp.ne.s32.totalorder %s4732_s23, %s3764_s18  ;;  %p3771_p7 = scmp.lt.u32.totalorder %s3769_s29, %s3764_s18 }
 0x181   : > { %p3773_p5 = scmp.lt.u32.totalorder %s3764_s18, %s4732_s23 }
 0x182   : > { %p3767_p10 = pnand %p3765_p0, %p5399_p8  ;;  %p3772_p12 = por %p3771_p7, %p3770_p6 }
 0x184   : > { %p3768_p4 = pneg %p3767_p10  ;;  %p3774_p2 = por %p3773_p5, %p3772_p12 }
 0x186   : > { %p3775_p11 = pnand %p3774_p2, %p3768_p4 }
 0x188   : > { %3778 = shalt.err (!%p3775_p11)
}
 0x189   : > { %s3779_s21 = scalar_lea.vmem %s1001_s26, 16  ;;  %s4061_s27 = smov [#allocation19]  }
 0x18a   : > { %p3780_p9 = scmp.ne.s32.totalorder %s1001_s26, %s3779_s21  ;;  %s3784_s6 = sshll.u32 %s4061_s27, 4  ;;  %s3785_s6 = int_to_ptr.vmem [resolvable:$false] %s3784_s6 }
 0x18b   : > { %s3786_s20 = scalar_lea.vmem %s3785_s6, 32  ;;  %p3787_p0 = scmp.lt.s32.totalorder %s1001_s26, %s3785_s6 }
 0x18c   : > { %p3782_p13 = pnand %p3780_p9, %p5399_p8  ;;  %p3788_p10 = scmp.lt.s32.totalorder %s3786_s20, %s3779_s21 }
 0x18e   : > { %p3783_p1 = pneg %p3782_p13  ;;  %p3789_p3 = por %p3788_p10, %p3787_p0 }
 0x190   : > { %p3790_p6 = pnand %p3789_p3, %p3783_p1 }
 0x192   : > { %3793 = shalt.err (!%p3790_p6)
}
 0x193   : > { %p5402_p7 = scmp.ne.s32.totalorder %s5375_s8, 0  ;;  %p5403_p4 = scmp.ne.s32.totalorder %s5350_s2, 0 }
 0x195   : > { %3249 = dma.hbm_to_vmem [thread:$0]  (!%p5402_p7), %s4732_s23, 16, %s1001_s26, %s4487_s7  }
 0x196   : > { %1021 = sbr.rel (%p5403_p4) target bundleno = 3845 (0xf05), region = 116 }
 0x19d   : > { %s5404_s19 = sld [smem:[#allocation44_spill]]  ;;  %s5405_s10 = sld [smem:[#allocation54_spill]] }
 0x19e   : > { %s4756_s25 = sand.u32 1, %s4279_s1  }
 0x19f   : > { %5406 = sst [smem:[#allocation62_spill]] %s4756_s25  ;;  %s4763_s0 = scalar_lea.sflag [#allocation5], %s4756_s25 }
 0x1a3   : > { %s4759_s16 = sand.u32 1, %s5404_s19   ;;  %p5407_p8 = scmp.ne.s32.totalorder %s5405_s10, 0 }
 0x1a4   : > { %s5300_s4 = sshll.u32 %s4759_s16, 3 }
 0x1a5   : > { %s4767_s8 = scalar_lea.vmem [#allocation4], %s5300_s4 }
 0x1a6   : > { %3935 = dma.done.wait (%p5407_p8), %s4763_s0, 128  }
 0x1a7   : > { %3937 = vsyncadd (%p5407_p8), %s4763_s0, 4294967168  ;;  %s4776_s7 = scalar_lea.sflag [#allocation8], %s4756_s25 }
 0x1a8   : > { %3939 = dma.done.wait (%p5407_p8), %s4776_s7, 16  }
 0x1a9   : > { %3941 = vsyncadd (%p5407_p8), %s4776_s7, 4294967280  ;;  %p5408_p3 = scmp.eq.s32.totalorder %s4279_s1, 0 }
 0x1ab   : > { %3943 = dma.done.wait (%p5408_p3), [#allocation8], 16   ;;  %p5409_p12 = pmov %p5408_p3 }
 0x1ac   : > { %p5410_p5 = pmov %p5408_p3 }
 0x1ad   : > { %3945 = vsyncadd (%p5409_p12), [#allocation8], 4294967280 }
 0x1ae   : > { %3947 = dma.done.wait (%p5410_p5), [#allocation11], 16   ;;  %p5411_p2 = pmov %p5408_p3 }
 0x1af   : > { %s5412_s23 = sld [smem:[#allocation41_spill]]  ;;  %s5413_s26 = sld [smem:[#allocation51_spill]] }
 0x1b0   : > { %3949 = vsyncadd (%p5411_p2), [#allocation11], 4294967280 }
 0x1b5   : > { %s4794_s18 = sand.u32 1, %s5412_s23   ;;  %p5414_p11 = scmp.ne.s32.totalorder %s5413_s26, 0 }
 0x1b7   : > { %3951 = dma.done.wait (%p5414_p11), %s4763_s0, 16  }
 0x1b8   : > { %3953 = vsyncadd (%p5414_p11), %s4763_s0, 4294967280 }
 0x1b9   : > { %3955 = dma.done.wait (%p5414_p11), %s4776_s7, 16  }
 0x1ba   : > { %3957 = vsyncadd (%p5414_p11), %s4776_s7, 4294967280 }
 0x1bb   : > { %3959 = dma.done.wait (%p5414_p11), %s4763_s0, 16  }
 0x1bc   : > { %3961 = vsyncadd (%p5414_p11), %s4763_s0, 4294967280 }
 0x1bd   : > { %3963 = dma.done.wait (%p5414_p11), %s4776_s7, 16  }
 0x1be   : > { %3965 = vsyncadd (%p5414_p11), %s4776_s7, 4294967280 }
 0x1bf   : > { %3967 = dma.done.wait (%p5414_p11), %s4763_s0, 16  }
 0x1c0   : > { %3969 = vsyncadd (%p5414_p11), %s4763_s0, 4294967280 }
 0x1c1   : > { %3971 = dma.done.wait (%p5414_p11), %s4776_s7, 16  }
 0x1c2   : > { %3973 = vsyncadd (%p5414_p11), %s4776_s7, 4294967280 }
 0x1c3   : > { %3975 = dma.done.wait (%p5414_p11), %s4763_s0, 16  }
 0x1c4   : > { %3977 = vsyncadd (%p5414_p11), %s4763_s0, 4294967280 }
 0x1c5   : > { %3979 = dma.done.wait (%p5414_p11), %s4776_s7, 16  }
 0x1c6   : > { %3981 = vsyncadd (%p5414_p11), %s4776_s7, 4294967280  ;;  %s5415_s6 = sld [smem:[#allocation46_spill]]  ;;  %s1248_s20 = sand.u32 1, %s4000_s3  }
 0x1c7   : > { %s4853_s19 = sshll.u32 %s1248_s20, 3  ;;  %s5416_s27 = sld [smem:[#allocation67_spill]] }
 0x1c8   : > { %s5417_s29 = sld [smem:[#allocation69_spill]]  ;;  %s5418_s9 = sld [smem:[#allocation71_spill]] }
 0x1c9   : > { %s5419_s12 = sld [smem:[#allocation73_spill]]  ;;  %s5420_s26 = sld [smem:[#allocation77_spill]] }
 0x1ca   : > { %s5421_s30 = sld [smem:[#allocation79_spill]]  ;;  %s5422_s2 = sld [smem:[#allocation81_spill]] }
 0x1cb   : > { %s5423_s3 = sld [smem:[#allocation82_spill]]  ;;  %s1250_s25 = scalar_lea.vmem [#allocation21], %s4853_s19 }
 0x1cc   : > { %p1257_p9 = scmp.lt.s32.totalorder %s5415_s6, 1  ;;  %s1256_s15 = scalar_lea.vmem [#allocation23], %s4759_s16 }
 0x1cd   : > { %p2943_p13 = scmp.ne.s32.totalorder %s5415_s6, 0 }
 0x1ce   : > { %s4857_s10 = scalar_select %p1257_p9, %s5415_s6, 1 }
 0x1cf   : > { %v1298_v0 = vld [vmem:[%s4767_s8] sm:$0xff] (!%p2943_p13)  ;;  %vm1301_vm0 = vcmask (!%p2943_p13), 261120   ;;  %v2944_v11 = vld [vmem:[#allocation9] ss:$0 sm:$0xff] (!%p2943_p13)  ;;  %v2945_v13 = vld [vmem:[#allocation10] ss:$0 sm:$0xff] (!%p2943_p13) }
 0x1d0   : > { %s3002_s0 = sshll.u32 %s4857_s10, 4  ;;  %s3007_s23 = sshll.u32 %s4857_s10, 6  ;;  %v1302_v1 = vsel (!%p2943_p13), %vm1301_vm0, %v1298_v0, 0.0 }
 0x1d1   : > { %s4864_s21 = scalar_lea.vmem %s5416_s27, %s3002_s0  ;;  %s4869_s20 = scalar_lea.vmem %s5417_s29, %s3002_s0  ;;  %1303 = vadd.xlane.f32.xlu0 (!%p2943_p13), %v1302_v1 }
 0x1d2   : > { %s4874_s5 = scalar_lea.vmem %s5418_s9, %s3002_s0  ;;  %s4879_s13 = scalar_lea.vmem %s5419_s12, %s3002_s0 }
 0x1d3   : > { %s4884_s27 = scalar_lea.vmem %s5420_s26, %s3002_s0  ;;  %s4889_s29 = scalar_lea.vmem %s5421_s30, %s3007_s23 }
 0x1d4   : > { %s1289_s9 = scalar_lea.vmem %s5422_s2, %s4857_s10  ;;  %s1292_s11 = scalar_lea.vmem %s5423_s3, %s4857_s10 }
 0x1d5   : > { %s5424_s12 = sshll.u32 %s4759_s16, 3  ;;  %1297 = sbr.rel (%p2943_p13) target bundleno = 778 (0x30a), region = 168 }
 0x1d6   : > { %s4901_s4 = scalar_lea.vmem [#allocation20], %s5424_s12 }
 0x25e   : > { %v1304_v2 = vpop.xlane.xlu0 %1303 }
 0x25f   : > { %v1306_v3 = vmul.f32 0.03125, %v1304_v2 }
 0x261   : > { %v1307_v4 = vsub.f32 %v1298_v0, %v1306_v3 }
 0x263   : > { %v1308_v5 = vmul.f32 %v1307_v4, %v1307_v4 }
 0x265   : > { %v1309_v6 = vsel %vm1301_vm0, %v1308_v5, 0.0 }
 0x266   : > { %1310 = vadd.xlane.f32.xlu0 %v1309_v6 }
 0x2f3   : > { %v1311_v7 = vpop.xlane.xlu0 %1310 }
 0x2f4   : > { %v1312_v8 = vmul.f32 0.03125, %v1311_v7 }
 0x2f6   : > { %v1313_v9 = vadd.f32 1e-12, %v1312_v8 }
 0x2f8   : > { %3390 = vrsqrt.f32 %v1313_v9 }
 0x302   : > { %v3391_v10 = vpop.eup %3390 }
 0x303   : > { %v1315_v12 = vmul.f32 %v3391_v10, %v1307_v4 }
 0x305   : > { %v1322_v14 = vmul.f32 %v2944_v11, %v1315_v12 }
 0x307   : > { %v1329_v15 = vadd.f32 %v2945_v13, %v1322_v14 }
 0x309   : > { %1330 = vst.msk [vmem:[#allocation2] sm:$0xff] %vm1301_vm0, %v1329_v15  ;;  %1331 = vst.msk [vmem:[%s4901_s4] sm:$0xff] %vm1301_vm0, %v1329_v15 }
 0x30a PF: > { %v3392_v16 = vld [vmem:[%s4864_s21] sm:$0xff]   ;;  %v4062_v17 = vmov 0.0   ;;  %v3393_v18 = vld [vmem:[%s4864_s21 + $0x8] sm:$0xff]   ;;  %vm4063_vm1 = vmmov 0   ;;  %vm1360_vm2 = vcmask 261120   ;;  %s5425_s17 = scalar_lea.vmem [#allocation13], %s4794_s18  ;;  %v1582_v49 = vlaneseq }
 0x30b   : > { %3054 = vmatprep.subr.bf16.mxu0 %v4062_v17  ;;  %3078 = vmatprep.subr.bf16.mxu1 %v4062_v17  ;;  %v3394_v20 = vld [vmem:[%s4869_s20] sm:$0xff]   ;;  %v3395_v22 = vld [vmem:[%s4869_s20 + $0x8] sm:$0xff]   ;;  %s5426_s3 = scalar_lea.vmem [#allocation12], %s4794_s18  ;;  %vm1533_vm3 = vcmask 64512   ;;  %s4064_s14 = smov 112   ;;  %vm1603_vm4 = vcmask 1043456  }
 0x30c   : > { %3055 = vmatpush3.bf16.msra.mxu0 %v3392_v16  ;;  %3058 = vmatprep.mubr.msk.bf16.mxu0 %vm4063_vm1, %v4062_v17  ;;  %v2950_v27 = vld [vmem:[%s5425_s17] ss:$0 sm:$0xff]  ;;  %s4065_s22 = smov 120   ;;  %s4066_s24 = smov 104   ;;  %v3397_v39 = vld [vmem:[%s4874_s5 + $0x8] sm:$0xff]   ;;  %v1583_v52 = vshrl.u32 %v1582_v49, 7 }
 0x30d   : > { %3056 = vmatprep.subr.bf16.mxu0 %v4062_v17  ;;  %3080 = vmatprep.mubr.msk.bf16.mxu1 %vm4063_vm1, %v4062_v17  ;;  %v2946_v28 = vld [vmem:[%s5426_s3] ss:$0 sm:$0xff]  ;;  %s5427_s8 = scalar_lea.vmem [#allocation7], %s4759_s16  ;;  %s4067_s21 = smov 8   ;;  %vm1767_vm5 = vcmask 130112   ;;  %vm1885_vm6 = vcmask 195712  }
 0x30e   : > { %v3396_v38 = vld [vmem:[%s4874_s5] sm:$0xff]   ;;  %v1584_v54 = vsub.s32 0, %v1583_v52  ;;  %s5428_s5 = scalar_lea.vmem [#allocation14], %s4794_s18  ;;  %s4068_s6 = smov 16   ;;  %vm2003_vm7 = vcmask 261312  }
 0x30f   : > { %v1334_v50 = vld [vmem:[%s5427_s8] sm:$0x1]  ;;  %s4069_s0 = smov 24   ;;  %s5430_s23 = scalar_lea.vmem [#allocation16], %s4794_s18 }
 0x310   : > { %v4918_v19 = vld [vmem:[#allocation2] sm:$0xff]  ;;  %3057 = vmatpush3.bf16.msra.mxu0 %v3393_v18  ;;  %v1335_v51 = vsub.f32 1.0, %v1334_v50  ;;  %s5431_s20 = scalar_lea.vmem [#allocation17], %s4794_s18  ;;  %s5432_s26 = scalar_lea.vmem [#allocation18], %s4794_s18 }
 0x311   : > { %v1333_v21 = vpack.c.bf16 %v4918_v19, %v4918_v19  ;;  %3062 = vmatprep.subr.bf16.mxu0 %v4062_v17  ;;  %v2954_v63 = vld [vmem:[%s5428_s5] ss:$0 sm:$0xff]  ;;  %s5436_s1 = sld [smem:[#allocation46_spill]] }
 0x312   : > { %v1336_v53 = vmul.f32 -1e+09, %v1335_v51 }
 0x313   : > { %3059 = vmatmul.mubr.msk.bf16.vlgmr.msra.gmra.mrb[0].mxu0 %vm1360_vm2, %v1333_v21 }
 0x314   : > { %3063 = vmatpush3.bf16.msra.mxu0 %v3394_v20  ;;  %3066 = vmatprep.mubr.msk.bf16.mxu0 %vm4063_vm1, %v4062_v17  ;;  %v1585_v55 = vrot.slane %v1336_v53, %v1584_v54 }
 0x315   : > { %3064 = vmatprep.subr.bf16.mxu0 %v4062_v17 }
 0x317   : > { %p2987_p1 = scmp.ne.s32.totalorder %s5436_s1, 1 }
 0x318   : > { %3065 = vmatpush3.bf16.msra.mxu0 %v3395_v22  ;;  %s5437_s3 = sld [smem:[#allocation83_spill]] (!%p2987_p1)  ;;  %vm4071_vm8 = vmmov (!%p2987_p1), 0  }
 0x319   : > { %3070 = vmatprep.subr.bf16.mxu0 %v4062_v17 }
 0x31b   : > { %3067 = vmatmul.mubr.msk.bf16.vlgmr.msra.gmra.mrb[4].mxu0 %vm1360_vm2, %v1333_v21 }
 0x31c   : > { %3074 = vmatprep.mubr.msk.bf16.mxu0 %vm4063_vm1, %v4062_v17  ;;  %3071 = vmatpush3.bf16.msra.mxu0 %v3396_v38 }
 0x31d   : > { %3072 = vmatprep.subr.bf16.mxu0 %v4062_v17 }
 0x320   : > { %3073 = vmatpush3.bf16.msra.mxu0 %v3397_v39 }
 0x321   : > { %3084 = vmatprep.subr.bf16.mxu0 %v4062_v17 }
 0x323   : > { %3075 = vmatmul.mubr.msk.bf16.vlgmr.msra.gmra.mrb[8].mxu0 %vm1360_vm2, %v1333_v21 }
 0x324   : > { %3086 = vmatprep.mubr.msk.bf16.mxu0 %vm4063_vm1, %v4062_v17 }
 0x3e6   : > { %v1398_v23 = vpop.f32.mrb[0].mxu0 }
 0x3e7   : > { %v3060_v24 = vpop.f32.mrb[1].mxu0  ;;  %v1399_v33 = vadd.f32 %v2946_v28, %v1398_v23 }
 0x3e8   : > { %v1401_v25 = vpop.f32.mrb[2].mxu0 }
 0x3e9   : > { %v3061_v26 = vpop.f32.mrb[3].mxu0  ;;  %v1530_v37 = vpack.c.bf16 %v1399_v33, %v1399_v33 }
 0x3ee   : > { %v1461_v29 = vpop.f32.mrb[4].mxu0 }
 0x3ef   : > { %v1462_v30 = vadd.f32 %v2950_v27, %v1461_v29  ;;  %v3068_v31 = vpop.f32.mrb[5].mxu0 }
 0x3f0   : > { %v1464_v32 = vpop.f32.mrb[6].mxu0 }
 0x3f1   : > { %v1531_v34 = vpack.c.bf16 %v1462_v30, %v1462_v30  ;;  %v3069_v35 = vpop.f32.mrb[7].mxu0 }
 0x3f3   : > { %1771 = vrot.lane.b32.xlu1 %v1531_v34, %s4064_s14  ;;  %1652 = vrot.lane.b32.xlu0 %v1531_v34, %s4065_s22  ;;  %v1538_v36 = vsel %vm1533_vm3, %v1531_v34, 0 }
 0x3f4   : > { %3079 = vmatpush3.bf16.xpose.msra.mxu1 %v1538_v36 }
 0x3f5   : > { %3090 = vmatprep.subr.bf16.mxu1 %v4062_v17 }
 0x3f6   : > { %v1524_v0 = vpop.f32.mrb[8].mxu0 }
 0x3f7   : > { %1769 = vrot.lane.b32.xlu1 %v1530_v37, %s4064_s14  ;;  %1649 = vrot.lane.b32.xlu0 %v1530_v37, %s4065_s22  ;;  %v1525_v1 = vadd.f32 %v2954_v63, %v1524_v0  ;;  %v3076_v2 = vpop.f32.mrb[9].mxu0 }
 0x3f8   : > { %v1527_v3 = vpop.f32.mrb[10].mxu0 }
 0x3f9   : > { %v1532_v4 = vpack.c.bf16 %v1525_v1, %v1525_v1  ;;  %v3077_v5 = vpop.f32.mrb[11].mxu0 }
 0x3fb   : > { %1887 = vrot.lane.b32.xlu1 %v1530_v37, %s4066_s24  ;;  %1889 = vrot.lane.b32.xlu0 %v1531_v34, %s4066_s24  ;;  %v1605_v6 = vsel %vm1603_vm4, %v1532_v4, 0 }
 0x3fc   : > { %3081 = vmatmul.mubr.msk.bf16.vlgmr.msra.gmra.mrb[0].mxu1 %vm1533_vm3, %v1530_v37  ;;  %3085 = vmatpush3.bf16.msra.mxu0 %v1605_v6 }
 0x3fd   : > { %3092 = vmatprep.mubr.msk.bf16.mxu1 %vm4063_vm1, %v4062_v17  ;;  %3096 = vmatprep.subr.bf16.mxu0 %v4062_v17 }
 0x465   : > { %v1653_v40 = vpop.permute.xlu0 %1652  ;;  %v1772_v42 = vpop.permute.xlu1 %1771 }
 0x466   : > { %v1658_v41 = vsel %vm1533_vm3, %v1653_v40, 0  ;;  %v1777_v44 = vsel %vm1533_vm3, %v1772_v42, 0 }
 0x467   : > { %3091 = vmatpush3.bf16.xpose.msra.mxu1 %v1658_v41 }
 0x468   : > { %3102 = vmatprep.subr.bf16.mxu1 %v4062_v17 }
 0x469   : > { %v1650_v43 = vpop.permute.xlu0 %1649  ;;  %v1770_v46 = vpop.permute.xlu1 %1769 }
 0x46d   : > { %v1890_v45 = vpop.permute.xlu0 %1889  ;;  %v1888_v48 = vpop.permute.xlu1 %1887 }
 0x46e   : > { %3093 = vmatmul.mubr.msk.bf16.vlgmr.msra.gmra.mrb[4].mxu1 %vm1533_vm3, %v1650_v43  ;;  %v1895_v47 = vsel %vm1533_vm3, %v1890_v45, 0 }
 0x46f   : > { %3103 = vmatpush3.bf16.xpose.msra.mxu1 %v1777_v44  ;;  %3104 = vmatprep.mubr.msk.bf16.mxu1 %vm4063_vm1, %v4062_v17 }
 0x470   : > { %3114 = vmatprep.subr.bf16.mxu1 %v4062_v17 }
 0x476   : > { %3105 = vmatmul.mubr.msk.bf16.vlgmr.msra.gmra.mrb[8].mxu1 %vm1533_vm3, %v1770_v46 }
 0x477   : > { %3115 = vmatpush3.bf16.xpose.msra.mxu1 %v1895_v47  ;;  %3116 = vmatprep.mubr.msk.bf16.mxu1 %vm4063_vm1, %v4062_v17 }
 0x478   : > { %3126 = vmatprep.subr.bf16.mxu1 %v4062_v17 }
 0x47e   : > { %3117 = vmatmul.mubr.msk.bf16.vlgmr.msra.gmra.mrb[12].mxu1 %vm1533_vm3, %v1888_v48 }
 0x47f   : > { %3130 = vmatprep.mubr.msk.bf16.mxu1 %vm4063_vm1, %v4062_v17 }
 0x4cf   : > { %v1574_v56 = vpop.f32.mrb[0].mxu1 }
 0x4d0   : > { %v1580_v57 = vmul.f32 0.35355338, %v1574_v56  ;;  %v3082_v58 = vpop.f32.mrb[1].mxu1 }
 0x4d1   : > { %v1577_v59 = vpop.f32.mrb[2].mxu1 }
 0x4d2   : > { %v3083_v60 = vpop.f32.mrb[3].mxu1  ;;  %v1587_v61 = vadd.f32 %v1585_v55, %v1580_v57 }
 0x4d4   : > { %v1588_v62 = vsel %vm1533_vm3, %v1587_v61, -inf }
 0x4d5   : > { %1589 = vmax.xlane.f32.xlu0 %v1588_v62 }
 0x541   : > { %v1694_v7 = vpop.f32.mrb[4].mxu1 }
 0x542   : > { %v1700_v8 = vmul.f32 0.35355338, %v1694_v7  ;;  %v3094_v9 = vpop.f32.mrb[5].mxu1 }
 0x543   : > { %v1697_v10 = vpop.f32.mrb[6].mxu1 }
 0x544   : > { %v3095_v11 = vpop.f32.mrb[7].mxu1  ;;  %v1701_v12 = vadd.f32 %v1700_v8, %v1585_v55 }
 0x546   : > { %v1702_v13 = vsel %vm1533_vm3, %v1701_v12, -inf }
 0x547   : > { %1703 = vmax.xlane.f32.xlu1 %v1702_v13 }
 0x549   : > { %v1813_v14 = vpop.f32.mrb[8].mxu1 }
 0x54a   : > { %v1819_v15 = vmul.f32 0.35355338, %v1813_v14  ;;  %v3106_v16 = vpop.f32.mrb[9].mxu1 }
 0x54b   : > { %v1816_v18 = vpop.f32.mrb[10].mxu1  ;;  %v3398_v16 = vld [vmem:[%s4879_s13] sm:$0xff]  }
 0x54c   : > { %v3107_v20 = vpop.f32.mrb[11].mxu1  ;;  %v1820_v21 = vadd.f32 %v1819_v15, %v1585_v55  ;;  %3127 = vmatpush3.bf16.msra.mxu1 %v3398_v16  ;;  %v3399_v18 = vld [vmem:[%s4879_s13 + $0x8] sm:$0xff]   ;;  %s5429_s13 = scalar_lea.vmem [#allocation15], %s4794_s18 }
 0x54d   : > { %3128 = vmatprep.subr.bf16.mxu1 %v4062_v17 }
 0x54e   : > { %v1821_v22 = vsel %vm1533_vm3, %v1820_v21, -inf }
 0x54f   : > { %1822 = vmax.xlane.f32.xlu0 %v1821_v22 }
 0x550   : > { %3129 = vmatpush3.bf16.msra.mxu1 %v3399_v18 }
 0x551   : > { %v1931_v23 = vpop.f32.mrb[12].mxu1  ;;  %3142 = vmatprep.subr.bf16.mxu1 %v4062_v17 }
 0x552   : > { %v1937_v24 = vmul.f32 0.35355338, %v1931_v23  ;;  %v3118_v25 = vpop.f32.mrb[13].mxu1 }
 0x553   : > { %v1934_v26 = vpop.f32.mrb[14].mxu1 }
 0x554   : > { %v3119_v27 = vpop.f32.mrb[15].mxu1  ;;  %v1938_v28 = vadd.f32 %v1937_v24, %v1585_v55 }
 0x556   : > { %v1939_v29 = vsel %vm1533_vm3, %v1938_v28, -inf }
 0x557   : > { %1940 = vmax.xlane.f32.xlu0 %v1939_v29 }
 0x562   : > { %v1590_v30 = vpop.xlane.xlu0 %1589 }
 0x563   : > { %v1591_v31 = vsub.f32 %v1587_v61, %v1590_v30 }
 0x565   : > { %v1592_v32 = vmul.f32 1.442695, %v1591_v31 }
 0x567   : > { %3410 = vpow2.f32 %v1592_v32 }
 0x571   : > { %v3411_v33 = vpop.eup %3410 }
 0x572   : > { %v1594_v34 = vsel %vm1533_vm3, %v3411_v33, 0.0 }
 0x573   : > { %1595 = vadd.xlane.f32.xlu1 %v1594_v34 }
 0x584   : > { %1715 = vrot.lane.b32.xlu1 %v1532_v4, %s4065_s22 }
 0x5d4   : > { %v1704_v35 = vpop.xlane.xlu1 %1703 }
 0x5d5   : > { %v1705_v36 = vsub.f32 %v1701_v12, %v1704_v35 }
 0x5d7   : > { %v1706_v37 = vmul.f32 1.442695, %v1705_v36 }
 0x5d9   : > { %3412 = vpow2.f32 %v1706_v37 }
 0x5dc   : > { %v1823_v38 = vpop.xlane.xlu0 %1822 }
 0x5dd   : > { %v1824_v39 = vsub.f32 %v1820_v21, %v1823_v38 }
 0x5df   : > { %v1825_v40 = vmul.f32 1.442695, %v1824_v39 }
 0x5e1   : > { %3414 = vpow2.f32 %v1825_v40 }
 0x5e3   : > { %v3413_v41 = vpop.eup %3412 }
 0x5e4   : > { %v1941_v42 = vpop.xlane.xlu0 %1940  ;;  %v1708_v43 = vsel %vm1533_vm3, %v3413_v41, 0.0 }
 0x5e5   : > { %v1942_v44 = vsub.f32 %v1938_v28, %v1941_v42  ;;  %1709 = vadd.xlane.f32.xlu0 %v1708_v43 }
 0x5e7   : > { %v1943_v45 = vmul.f32 1.442695, %v1942_v44 }
 0x5e9   : > { %3416 = vpow2.f32 %v1943_v45 }
 0x5eb   : > { %v3415_v46 = vpop.eup %3414 }
 0x5ec   : > { %v1827_v47 = vsel %vm1533_vm3, %v3415_v46, 0.0 }
 0x5ed   : > { %1828 = vadd.xlane.f32.xlu1 %v1827_v47  ;;  %v3401_v47 = vld [vmem:[%s4884_s27 + $0x8] sm:$0xff]  }
 0x5f3   : > { %v3417_v48 = vpop.eup %3416 }
 0x5f4   : > { %v1945_v49 = vsel %vm1533_vm3, %v3417_v48, 0.0 }
 0x5f5   : > { %1946 = vadd.xlane.f32.xlu0 %v1945_v49 }
 0x5fe   : > { %1951 = vrot.lane.b32.xlu1 %v1532_v4, %s4066_s24  ;;  %s5439_s24 = sld [smem:[#allocation85_spill]] (!%p2987_p1) }
 0x600   : > { %v1596_v50 = vpop.xlane.xlu1 %1595 }
 0x601   : > { %3418 = vrcp.f32 %v1596_v50 }
 0x604   : > { %v1716_v52 = vpop.permute.xlu1 %1715 }
 0x605   : > { %v1721_v55 = vsel %vm1603_vm4, %v1716_v52, 0  ;;  %v2970_v52 = vld [vmem:[%s5430_s23] ss:$0 sm:$0xff] }
 0x60b   : > { %v3419_v51 = vpop.eup %3418  ;;  %1833 = vrot.lane.b32.xlu0 %v1532_v4, %s4064_s14  ;;  %s5438_s14 = smov (!%p2987_p1), %s5437_s3 }
 0x60c   : > { %v1598_v53 = vmul.f32 %v3419_v51, %v3411_v33  ;;  %v2966_v33 = vld [vmem:[%s5429_s13] ss:$0 sm:$0xff] }
 0x60e   : > { %v1599_v54 = vpack.c.bf16 %v1598_v53, %v1598_v53 }
 0x610   : > { %3087 = vmatmul.mubr.msk.bf16.vlgmr.msra.gmra.mrb[12].mxu0 %vm1533_vm3, %v1599_v54  ;;  %v2971_v54 = vld [vmem:[%s5431_s20] ss:$0 sm:$0xff]  ;;  %s5441_s20 = sld [smem:[#allocation86_spill]] (!%p2987_p1) }
 0x611   : > { %3097 = vmatpush3.bf16.msra.mxu0 %v1721_v55  ;;  %3098 = vmatprep.mubr.msk.bf16.mxu0 %vm4063_vm1, %v4062_v17 }
 0x612   : > { %3108 = vmatprep.subr.bf16.mxu0 %v4062_v17 }
 0x672   : > { %v1710_v56 = vpop.xlane.xlu0 %1709 }
 0x673   : > { %3420 = vrcp.f32 %v1710_v56 }
 0x67a   : > { %v1829_v57 = vpop.xlane.xlu1 %1828 }
 0x67b   : > { %3422 = vrcp.f32 %v1829_v57 }
 0x67d   : > { %v3421_v58 = vpop.eup %3420 }
 0x67e   : > { %v1712_v59 = vmul.f32 %v3421_v58, %v3413_v41  ;;  %v1952_v2 = vpop.permute.xlu1 %1951  ;;  %v3403_v58 = vld [vmem:[%s4889_s29 + $0x8] sm:$0xff]  }
 0x67f   : > { %v1957_v4 = vsel %vm1603_vm4, %v1952_v2, 0 }
 0x680   : > { %v1713_v60 = vpack.c.bf16 %v1712_v59, %v1712_v59  ;;  %v3404_v59 = vld [vmem:[%s4889_s29 + $0x10] sm:$0xff]  }
 0x682   : > { %v1947_v61 = vpop.xlane.xlu0 %1946  ;;  %3099 = vmatmul.mubr.msk.bf16.vlgmr.msra.gmra.mrb[16].mxu0 %vm1533_vm3, %v1713_v60  ;;  %v3405_v60 = vld [vmem:[%s4889_s29 + $0x18] sm:$0xff]  }
 0x683   : > { %3424 = vrcp.f32 %v1947_v61  ;;  %3110 = vmatprep.mubr.msk.bf16.mxu0 %vm4063_vm1, %v4062_v17  ;;  %v3406_v61 = vld [vmem:[%s4889_s29 + $0x20] sm:$0xff]  }
 0x685   : > { %v3423_v62 = vpop.eup %3422 }
 0x686   : > { %v1831_v63 = vmul.f32 %v3423_v62, %v3415_v46  ;;  %v1834_v0 = vpop.permute.xlu0 %1833  ;;  %v3400_v46 = vld [vmem:[%s4884_s27] sm:$0xff]   ;;  %v3407_v62 = vld [vmem:[%s4889_s29 + $0x28] sm:$0xff]   ;;  %s5433_s27 = scalar_lea.vmem [#allocation19], %s4794_s18 }
 0x687   : > { %v1839_v1 = vsel %vm1603_vm4, %v1834_v0, 0  ;;  %v3409_v0 = vld [vmem:[%s4889_s29 + $0x38] sm:$0xff]   ;;  %v2976_v16 = vld [vmem:[%s5433_s27] ss:$0 sm:$0xff] }
 0x688   : > { %3109 = vmatpush3.bf16.msra.mxu0 %v1839_v1  ;;  %v1832_v3 = vpack.c.bf16 %v1831_v63, %v1831_v63  ;;  %v3408_v63 = vld [vmem:[%s4889_s29 + $0x30] sm:$0xff]   ;;  %v2972_v1 = vld [vmem:[%s5432_s26] ss:$0 sm:$0xff] }
 0x689   : > { %3120 = vmatprep.subr.bf16.mxu0 %v4062_v17 }
 0x68b   : > { %3111 = vmatmul.mubr.msk.bf16.vlgmr.msra.gmra.mrb[20].mxu0 %vm1533_vm3, %v1832_v3 }
 0x68c   : > { %3121 = vmatpush3.bf16.msra.mxu0 %v1957_v4  ;;  %3122 = vmatprep.mubr.msk.bf16.mxu0 %vm4063_vm1, %v4062_v17 }
 0x68d   : > { %v3425_v5 = vpop.eup %3424  ;;  %3134 = vmatprep.subr.bf16.mxu0 %v4062_v17 }
 0x68e   : > { %v1949_v6 = vmul.f32 %v3425_v5, %v3417_v48 }
 0x690   : > { %v1950_v7 = vpack.c.bf16 %v1949_v6, %v1949_v6 }
 0x693   : > { %3123 = vmatmul.mubr.msk.bf16.vlgmr.msra.gmra.mrb[24].mxu0 %vm1533_vm3, %v1950_v7 }
 0x694   : > { %3138 = vmatprep.mubr.msk.bf16.mxu0 %vm4063_vm1, %v4062_v17  ;;  %3135 = vmatpush3.bf16.msra.mxu0 %v3400_v46 }
 0x695   : > { %3136 = vmatprep.subr.bf16.mxu0 %v4062_v17 }
 0x698   : > { %3137 = vmatpush3.bf16.msra.mxu0 %v3401_v47 }
 0x6e3   : > { %v1641_v8 = vpop.f32.mrb[12].mxu0 }
 0x6e4   : > { %1647 = vst.msk [vmem:[#allocation3] sm:$0xff] %vm1533_vm3, %v1641_v8  ;;  %v3088_v9 = vpop.f32.mrb[13].mxu0 }
 0x6e5   : > { %v1644_v10 = vpop.f32.mrb[14].mxu0 }
 0x6e6   : > { %v3089_v11 = vpop.f32.mrb[15].mxu0 }
 0x755   : > { %v1757_v12 = vpop.f32.mrb[16].mxu0 }
 0x756   : > { %1764 = vrot.lane.b32.xlu1 %v1757_v12, %s4067_s21  ;;  %v3100_v13 = vpop.f32.mrb[17].mxu0 }
 0x757   : > { %v1760_v14 = vpop.f32.mrb[18].mxu0 }
 0x758   : > { %v3101_v15 = vpop.f32.mrb[19].mxu0 }
 0x75e   : > { %v1875_v20 = vpop.f32.mrb[20].mxu0 }
 0x75f   : > { %1882 = vrot.lane.b32.xlu0 %v1875_v20, %s4068_s6  ;;  %v3112_v21 = vpop.f32.mrb[21].mxu0 }
 0x760   : > { %v1878_v22 = vpop.f32.mrb[22].mxu0 }
 0x761   : > { %v3113_v23 = vpop.f32.mrb[23].mxu0 }
 0x766   : > { %v1993_v24 = vpop.f32.mrb[24].mxu0 }
 0x767   : > { %2000 = vrot.lane.b32.xlu1 %v1993_v24, %s4069_s0  ;;  %v3124_v25 = vpop.f32.mrb[25].mxu0  ;;  %s5440_s0 = sld [smem:[#allocation84_spill]] (!%p2987_p1) }
 0x768   : > { %v1996_v26 = vpop.f32.mrb[26].mxu0 }
 0x769   : > { %v3125_v27 = vpop.f32.mrb[27].mxu0 }
 0x76d   : > { %v2333_v46 = vld [vmem:[%s5440_s0] sm:$0x1] (!%p2987_p1) }
 0x7c8   : > { %v1765_v28 = vpop.permute.xlu1 %1764 }
 0x7c9   : > { %1768 = vst.msk [vmem:[#allocation3] sm:$0xff] %vm1767_vm5, %v1765_v28 }
 0x7d1   : > { %v1883_v29 = vpop.permute.xlu0 %1882 }
 0x7d2   : > { %1886 = vst.msk [vmem:[#allocation3] sm:$0xff] %vm1885_vm6, %v1883_v29 }
 0x7d9   : > { %v2001_v30 = vpop.permute.xlu1 %2000 }
 0x7da   : > { %2004 = vst.msk [vmem:[#allocation3] sm:$0xff] %vm2003_vm7, %v2001_v30 }
 0x7e1   : > { %v2005_v31 = vld [vmem:[#allocation3] sm:$0xff] }
 0x7e2   : > { %v2006_v32 = vpack.c.bf16 %v2005_v31, %v2005_v31 }
 0x7e4   : > { %3131 = vmatmul.mubr.msk.bf16.vlgmr.msra.gmra.mrb[16].mxu1 %vm1360_vm2, %v2006_v32 }
 0x7e5   : > { %3158 = vmatprep.mubr.msk.bf16.mxu1 %vm4063_vm1, %v4062_v17 }
 0x8b7   : > { %v2067_v34 = vpop.f32.mrb[16].mxu1 }
 0x8b8   : > { %v2068_v35 = vadd.f32 %v2966_v33, %v2067_v34  ;;  %v3132_v36 = vpop.f32.mrb[17].mxu1 }
 0x8b9   : > { %v2070_v37 = vpop.f32.mrb[18].mxu1 }
 0x8ba   : > { %v3133_v38 = vpop.f32.mrb[19].mxu1  ;;  %v2073_v39 = vadd.f32 %v2068_v35, %v4918_v19  ;;  %v3402_v19 = vld [vmem:[%s4889_s29] sm:$0xff]  }
 0x8bb   : > { %3143 = vmatpush3.bf16.msra.mxu1 %v3402_v19  ;;  %v2985_v35 = vld [vmem:[%s1289_s9] ss:$0 sm:$0xff] }
 0x8bc   : > { %v2076_v40 = vsel %vm1360_vm2, %v2073_v39, 0.0  ;;  %3144 = vmatprep.subr.bf16.mxu1 %v4062_v17  ;;  %v2986_v37 = vld [vmem:[%s1292_s11] ss:$0 sm:$0xff] }
 0x8bd   : > { %2077 = vadd.xlane.f32.xlu0 %v2076_v40  ;;  %v3432_v40 = vld [vmem:[%s5437_s3] sm:$0xff] (!%p2987_p1)  }
 0x8bf   : > { %3145 = vmatpush3.bf16.msra.mxu1 %v3403_v58 }
 0x8c0   : > { %3146 = vmatprep.subr.bf16.mxu1 %v4062_v17 }
 0x8c3   : > { %3147 = vmatpush3.bf16.msra.mxu1 %v3404_v59 }
 0x8c4   : > { %3148 = vmatprep.subr.bf16.mxu1 %v4062_v17 }
 0x8c7   : > { %3149 = vmatpush3.bf16.msra.mxu1 %v3405_v60 }
 0x8c8   : > { %3150 = vmatprep.subr.bf16.mxu1 %v4062_v17 }
 0x8cb   : > { %3151 = vmatpush3.bf16.msra.mxu1 %v3406_v61 }
 0x8cc   : > { %3152 = vmatprep.subr.bf16.mxu1 %v4062_v17 }
 0x8cf   : > { %3153 = vmatpush3.bf16.msra.mxu1 %v3407_v62 }
 0x8d0   : > { %3154 = vmatprep.subr.bf16.mxu1 %v4062_v17 }
 0x8d3   : > { %3155 = vmatpush3.bf16.msra.mxu1 %v3408_v63 }
 0x8d4   : > { %3156 = vmatprep.subr.bf16.mxu1 %v4062_v17 }
 0x8d7   : > { %3157 = vmatpush3.bf16.msra.mxu1 %v3409_v0 }
 0x94a   : > { %v2078_v41 = vpop.xlane.xlu0 %2077 }
 0x94b   : > { %v2080_v42 = vmul.f32 0.03125, %v2078_v41  ;;  %v4070_v41 = vmov (!%p2987_p1), 0.0  }
 0x94c   : > { %3162 = vmatprep.subr.bf16.mxu0 (!%p2987_p1), %v4070_v41  ;;  %3170 = vmatprep.subr.bf16.mxu1 (!%p2987_p1), %v4070_v41 }
 0x94d   : > { %v2081_v43 = vsub.f32 %v2073_v39, %v2080_v42  ;;  %v3433_v42 = vld [vmem:[%s5438_s14 + $0x8] sm:$0xff] (!%p2987_p1)  }
 0x94f   : > { %v2082_v44 = vmul.f32 %v2081_v43, %v2081_v43 }
 0x951   : > { %v2083_v45 = vsel %vm1360_vm2, %v2082_v44, 0.0  ;;  %v3434_v44 = vld [vmem:[%s5439_s24] sm:$0xff] (!%p2987_p1)  }
 0x952   : > { %2084 = vadd.xlane.f32.xlu1 %v2083_v45  ;;  %v3435_v45 = vld [vmem:[%s5439_s24 + $0x8] sm:$0xff] (!%p2987_p1)  }
 0x9df   : > { %v2085_v48 = vpop.xlane.xlu1 %2084 }
 0x9e0   : > { %v2086_v49 = vmul.f32 0.03125, %v2085_v48 }
 0x9e2   : > { %v2087_v50 = vadd.f32 1e-12, %v2086_v49 }
 0x9e4   : > { %3426 = vrsqrt.f32 %v2087_v50 }
 0x9ee   : > { %v3427_v51 = vpop.eup %3426 }
 0x9ef   : > { %v2089_v53 = vmul.f32 %v3427_v51, %v2081_v43 }
 0x9f1   : > { %v2096_v55 = vmul.f32 %v2970_v52, %v2089_v53  ;;  %v2395_v53 = vld [vmem:[%s5441_s20] sm:$0x1] (!%p2987_p1) }
 0x9f3   : > { %v2103_v56 = vadd.f32 %v2971_v54, %v2096_v55 }
 0x9f5   : > { %v2104_v57 = vpack.c.bf16 %v2103_v56, %v2103_v56 }
 0x9f7   : > { %3139 = vmatmul.mubr.msk.bf16.vlgmr.msra.gmra.mrb[28].mxu0 %vm1360_vm2, %v2104_v57 }
 0x9f8   : > { %3163 = vmatpush3.bf16.msra.mxu0 (!%p2987_p1), %v3432_v40  ;;  %3166 = vmatprep.mubr.msk.bf16.mxu0 (!%p2987_p1), %vm4071_vm8, %v4070_v41 }
 0x9f9   : > { %3164 = vmatprep.subr.bf16.mxu0 (!%p2987_p1), %v4070_v41 }
 0x9fc   : > { %3165 = vmatpush3.bf16.msra.mxu0 (!%p2987_p1), %v3433_v42 }
 0xaca   : > { %v2165_v2 = vpop.f32.mrb[28].mxu0 }
 0xacb   : > { %v2166_v3 = vadd.f32 %v2972_v1, %v2165_v2  ;;  %v3140_v4 = vpop.f32.mrb[29].mxu0 }
 0xacc   : > { %v2168_v5 = vpop.f32.mrb[30].mxu0 }
 0xacd   : > { %v2172_v6 = vmul.f32 0.044715, %v2166_v3  ;;  %v3141_v7 = vpop.f32.mrb[31].mxu0  ;;  %v2171_v13 = vmul.f32 0.5, %v2166_v3 }
 0xacf   : > { %v2173_v8 = vmul.f32 %v2172_v6, %v2166_v3 }
 0xad1   : > { %v2174_v9 = vmul.f32 %v2173_v8, %v2166_v3 }
 0xad3   : > { %v2175_v10 = vadd.f32 %v2174_v9, %v2166_v3 }
 0xad5   : > { %v2176_v11 = vmul.f32 0.7978846, %v2175_v10 }
 0xad7   : > { %3428 = vtanh.f32 %v2176_v11 }
 0xae1   : > { %v3429_v12 = vpop.eup %3428 }
 0xae2   : > { %v2178_v14 = vadd.f32 1.0, %v3429_v12 }
 0xae4   : > { %v2179_v15 = vmul.f32 %v2178_v14, %v2171_v13 }
 0xae6   : > { %v2180_v17 = vpack.c.bf16 %v2179_v15, %v2179_v15 }
 0xae8   : > { %3159 = vmatmul.mubr.bf16.vlgmr.msra.gmra.mrb[20].mxu1 %v2180_v17 }
 0xae9   : > { %3174 = vmatprep.mubr.msk.bf16.mxu1 (!%p2987_p1), %vm4071_vm8, %v4070_v41  ;;  %3171 = vmatpush3.bf16.msra.mxu1 (!%p2987_p1), %v3434_v44 }
 0xaea   : > { %3172 = vmatprep.subr.bf16.mxu1 (!%p2987_p1), %v4070_v41 }
 0xaed   : > { %3173 = vmatpush3.bf16.msra.mxu1 (!%p2987_p1), %v3435_v45 }
 0xbbb   : > { %v2286_v18 = vpop.f32.mrb[20].mxu1 }
 0xbbc   : > { %v2287_v20 = vadd.f32 %v2976_v16, %v2286_v18  ;;  %v3160_v21 = vpop.f32.mrb[21].mxu1 }
 0xbbd   : > { %v2289_v22 = vpop.f32.mrb[22].mxu1 }
 0xbbe   : > { %v3161_v23 = vpop.f32.mrb[23].mxu1  ;;  %v2292_v24 = vadd.f32 %v2287_v20, %v2103_v56 }
 0xbc0   : > { %v2295_v25 = vsel %vm1360_vm2, %v2292_v24, 0.0 }
 0xbc1   : > { %2296 = vadd.xlane.f32.xlu0 %v2295_v25 }
 0xc4e   : > { %v2297_v26 = vpop.xlane.xlu0 %2296 }
 0xc4f   : > { %v2298_v27 = vmul.f32 0.03125, %v2297_v26 }
 0xc51   : > { %v2299_v28 = vsub.f32 %v2292_v24, %v2298_v27 }
 0xc53   : > { %v2300_v29 = vmul.f32 %v2299_v28, %v2299_v28 }
 0xc55   : > { %v2301_v30 = vsel %vm1360_vm2, %v2300_v29, 0.0 }
 0xc56   : > { %2302 = vadd.xlane.f32.xlu0 %v2301_v30 }
 0xce3   : > { %v2303_v31 = vpop.xlane.xlu0 %2302 }
 0xce4   : > { %v2304_v32 = vmul.f32 0.03125, %v2303_v31 }
 0xce6   : > { %v2305_v33 = vadd.f32 1e-12, %v2304_v32 }
 0xce8   : > { %3430 = vrsqrt.f32 %v2305_v33 }
 0xcf2   : > { %v3431_v34 = vpop.eup %3430 }
 0xcf3   : > { %v2307_v36 = vmul.f32 %v3431_v34, %v2299_v28  ;;  %2327 = sbr.rel (%p2987_p1) target bundleno = 3765 (0xeb5), region = 172 }
 0xcf5   : > { %v2314_v38 = vmul.f32 %v2985_v35, %v2307_v36 }
 0xcf7   : > { %v2321_v39 = vadd.f32 %v2986_v37, %v2314_v38 }
 0xcf9   : > { %2322 = vst.msk [vmem:[#allocation2] sm:$0xff] %vm1360_vm2, %v2321_v39  ;;  %2323 = vst.msk [vmem:[%s1250_s25] sm:$0xff] %vm1360_vm2, %v2321_v39  ;;  %v2328_v43 = vpack.c.bf16 (!%p2987_p1), %v2321_v39, %v2321_v39 }
 0xcfb   : > { %3167 = vmatmul.mubr.msk.bf16.vlgmr.msra.gmra.mrb[0].mxu0 %vm1360_vm2, %v2328_v43 }
 0xdce   : > { %v2383_v47 = vpop.f32.mrb[0].mxu0 }
 0xdcf   : > { %v2384_v19 = vadd.f32 %v2383_v47, %v2333_v46  ;;  %v3168_v48 = vpop.f32.mrb[1].mxu0 }
 0xdd0   : > { %v2386_v49 = vpop.f32.mrb[2].mxu0 }
 0xdd1   : > { %3436 = vtanh.f32 %v2384_v19  ;;  %v3169_v50 = vpop.f32.mrb[3].mxu0 }
 0xddb   : > { %v3437_v51 = vpop.eup %3436 }
 0xddc   : > { %v2390_v52 = vpack.c.bf16 %v3437_v51, %v3437_v51 }
 0xdde   : > { %3175 = vmatmul.mubr.msk.bf16.vlgmr.msra.gmra.mrb[0].mxu1 %vm1360_vm2, %v2390_v52 }
 0xeb1   : > { %v2445_v54 = vpop.f32.mrb[0].mxu1 }
 0xeb2   : > { %v2446_v55 = vadd.f32 %v2445_v54, %v2395_v53  ;;  %v3176_v56 = vpop.f32.mrb[1].mxu1 }
 0xeb3   : > { %v2448_v57 = vpop.f32.mrb[2].mxu1 }
 0xeb4   : > { %2451 = vst [vmem:[%s1256_s15] sm:$0x1] %v2446_v55  ;;  %v3177_v58 = vpop.f32.mrb[3].mxu1 }
 0xeb5 PF: > { %s5442_s26 = sld [smem:[#allocation46_spill]]  ;;  %s5443_s27 = sld [smem:[#allocation47_spill]] }
 0xeb6   : > { %s5444_s18 = sld [smem:[#allocation62_spill]]  ;;  %s5445_s7 = sld [smem:[#allocation52_spill]] }
 0xeb7   : > { %s2490_s28 = sshll.u32 %s1250_s25, 4  ;;  %s5446_s17 = sld [smem:[#allocation88_spill]]  ;;  %s5091_s28 = int_to_ptr.vmem [resolvable:$true] %s2490_s28 }
 0xeb8   : > { %s3794_s9 = scalar_lea.vmem %s5091_s28, 128  ;;  %s4072_s11 = smov [#allocation21]  }
 0xeb9   : > { %p3795_p0 = scmp.ne.s32.totalorder %s5091_s28, %s3794_s9  ;;  %s3798_s22 = sshll.u32 %s4072_s11, 4  ;;  %s3799_s22 = int_to_ptr.vmem [resolvable:$false] %s3798_s22 }
 0xeba   : > { %s3800_s25 = scalar_lea.vmem %s3799_s22, 256  ;;  %p3801_p4 = scmp.lt.s32.totalorder %s5091_s28, %s3799_s22 }
 0xebb   : > { %s2997_s30 = sshll.u32 %s5442_s26, 1  ;;  %p3802_p8 = scmp.lt.s32.totalorder %s3800_s25, %s3794_s9 }
 0xebc   : > { %s2486_s29 = sadd.s32 %s5443_s27, %s2997_s30  ;;  %s2458_s10 = scalar_lea.sflag [#allocation22], %s5444_s18 }
 0xebd   : > { %s2998_s2 = sshll.u32 %s2486_s29, 7  ;;  %p5447_p10 = scmp.ne.s32.totalorder %s5445_s7, 0 }
 0xebe   : > { %s2488_s3 = scalar_lea.hbm %s5446_s17, %s2998_s2  ;;  %p3803_p3 = por %p3802_p8, %p3801_p4 }
 0xebf   : > { %p3796_p6 = pnand %p3795_p0, %p5447_p10 }
 0xec1   : > { %p3797_p7 = pneg %p3796_p6 }
 0xec3   : > { %p3804_p12 = pnand %p3803_p3, %p3797_p7 }
 0xec5   : > { %3807 = shalt.err (!%p3804_p12)
}
 0xec6   : > { %s3808_s19 = scalar_lea.hbm %s2488_s3, 128  ;;  %s3812_s21 = scalar_lea.hbm %s5446_s17, 512 }
 0xec7   : > { %p3809_p5 = scmp.ne.s32.totalorder %s2488_s3, %s3808_s19  ;;  %p3813_p9 = scmp.lt.u32.totalorder %s2488_s3, %s5446_s17 }
 0xec8   : > { %p3814_p13 = scmp.lt.u32.totalorder %s3812_s21, %s3808_s19  ;;  %p3816_p0 = scmp.lt.u32.totalorder %s3808_s19, %s2488_s3 }
 0xec9   : > { %p3810_p2 = pnand %p3809_p5, %p5447_p10 }
 0xeca   : > { %p3815_p1 = por %p3814_p13, %p3813_p9 }
 0xecb   : > { %p3811_p11 = pneg %p3810_p2 }
 0xecc   : > { %p3817_p6 = por %p3816_p0, %p3815_p1 }
 0xece   : > { %p3818_p7 = pnand %p3817_p6, %p3811_p11 }
 0xed0   : > { %3821 = shalt.err (!%p3818_p7)
}
 0xed1   : > { %s5448_s13 = sld [smem:[#allocation56_spill]]  ;;  %s2996_s23 = sshll.u32 %s5443_s27, 7 }
 0xed2   : > { %3207 = dma.vmem_to_hbm [thread:$0]  (%p5447_p10), %s5091_s28, 128, %s2488_s3, %s2458_s10  }
 0xed3   : > { %s2475_s20 = sshll.u32 %s4901_s4, 4  ;;  %s5449_s29 = sld [smem:[#allocation87_spill]]  ;;  %s2476_s20 = int_to_ptr.vmem [resolvable:$true] %s2475_s20 }
 0xed4   : > { %s2453_s12 = scalar_lea.sflag [#allocation6], %s4759_s16  ;;  %s3822_s9 = scalar_lea.vmem %s2476_s20, 128 }
 0xed5   : > { %p3823_p4 = scmp.ne.s32.totalorder %s2476_s20, %s3822_s9  ;;  %s4073_s7 = smov [#allocation20]  }
 0xed6   : > { %s3826_s11 = sshll.u32 %s4073_s7, 4  ;;  %s3827_s11 = int_to_ptr.vmem [resolvable:$false] %s3826_s11 }
 0xed7   : > { %p5451_p8 = scmp.ne.s32.totalorder %s5448_s13, 0  ;;  %s3828_s22 = scalar_lea.vmem %s3827_s11, 256 }
 0xed8   : > { %p3829_p5 = scmp.lt.s32.totalorder %s2476_s20, %s3827_s11  ;;  %p3830_p10 = scmp.lt.s32.totalorder %s3828_s22, %s3822_s9 }
 0xed9   : > { %s5450_s1 = smov %s5449_s29  ;;  %s5120_s2 = scalar_lea.hbm %s5449_s29, %s2996_s23 }
 0xeda   : > { %p3824_p3 = pnand %p3823_p4, %p5451_p8  ;;  %p3831_p2 = por %p3830_p10, %p3829_p5 }
 0xedc   : > { %p3825_p12 = pneg %p3824_p3 }
 0xede   : > { %p3832_p11 = pnand %p3831_p2, %p3825_p12 }
 0xee0   : > { %3835 = shalt.err (!%p3832_p11)
}
 0xee1   : > { %s3836_s4 = scalar_lea.hbm %s5120_s2, 128  ;;  %s3840_s25 = scalar_lea.hbm %s5450_s1, 256 }
 0xee2   : > { %p3837_p9 = scmp.ne.s32.totalorder %s5120_s2, %s3836_s4  ;;  %p3841_p0 = scmp.lt.u32.totalorder %s5120_s2, %s5450_s1 }
 0xee3   : > { %p3842_p6 = scmp.lt.u32.totalorder %s3840_s25, %s3836_s4  ;;  %p3844_p4 = scmp.lt.u32.totalorder %s3836_s4, %s5120_s2 }
 0xee4   : > { %p3838_p13 = pnand %p3837_p9, %p5451_p8 }
 0xee5   : > { %p3843_p7 = por %p3842_p6, %p3841_p0 }
 0xee6   : > { %p3839_p1 = pneg %p3838_p13 }
 0xee7   : > { %p3845_p3 = por %p3844_p4, %p3843_p7 }
 0xee9   : > { %p3846_p12 = pnand %p3845_p3, %p3839_p1 }
 0xeeb   : > { %3849 = shalt.err (!%p3846_p12)
}
 0xeec   : > { %3206 = dma.vmem_to_hbm [thread:$0]  (%p5451_p8), %s2476_s20, 128, %s5120_s2, %s2453_s12  }
 0xeed   : > { %s2999_s5 = sshll.u32 %s5443_s27, 4  ;;  %s2503_s21 = sshll.u32 %s1256_s15, 4  ;;  %s2504_s21 = int_to_ptr.vmem [resolvable:$true] %s2503_s21 }
 0xeee   : > { %s5452_s23 = sld [smem:[#allocation89_spill]]  ;;  %s3850_s30 = scalar_lea.vmem %s2504_s21, 16 }
 0xeef   : > { %p3851_p5 = scmp.ne.s32.totalorder %s2504_s21, %s3850_s30  ;;  %s4074_s29 = smov [#allocation23]  }
 0xef0   : > { %s3854_s9 = sshll.u32 %s4074_s29, 4  ;;  %s3855_s9 = int_to_ptr.vmem [resolvable:$false] %s3854_s9 }
 0xef1   : > { %p3852_p10 = pnand %p3851_p5, %p5451_p8  ;;  %s3856_s7 = scalar_lea.vmem %s3855_s9, 32 }
 0xef2   : > { %p3857_p11 = scmp.lt.s32.totalorder %s2504_s21, %s3855_s9  ;;  %p3858_p9 = scmp.lt.s32.totalorder %s3856_s7, %s3850_s30 }
 0xef3   : > { %p3853_p2 = pneg %p3852_p10 }
 0xef4   : > { %s2501_s26 = scalar_lea.hbm %s5452_s23, %s2999_s5  ;;  %p3859_p13 = por %p3858_p9, %p3857_p11 }
 0xef6   : > { %p3860_p1 = pnand %p3859_p13, %p3853_p2 }
 0xef8   : > { %3863 = shalt.err (!%p3860_p1)
}
 0xef9   : > { %s3864_s16 = scalar_lea.hbm %s2501_s26, 16  ;;  %s3868_s20 = scalar_lea.hbm %s5452_s23, 32 }
 0xefa   : > { %p3865_p0 = scmp.ne.s32.totalorder %s2501_s26, %s3864_s16  ;;  %p3869_p4 = scmp.lt.u32.totalorder %s2501_s26, %s5452_s23 }
 0xefb   : > { %p3870_p3 = scmp.lt.u32.totalorder %s3868_s20, %s3864_s16  ;;  %p3872_p5 = scmp.lt.u32.totalorder %s3864_s16, %s2501_s26 }
 0xefc   : > { %p3866_p6 = pnand %p3865_p0, %p5451_p8 }
 0xefd   : > { %p3871_p12 = por %p3870_p3, %p3869_p4 }
 0xefe   : > { %p3867_p7 = pneg %p3866_p6 }
 0xeff   : > { %p3873_p10 = por %p3872_p5, %p3871_p12 }
 0xf01   : > { %p3874_p2 = pnand %p3873_p10, %p3867_p7 }
 0xf03   : > { %3877 = shalt.err (!%p3874_p2)
}
 0xf04   : > { %3208 = dma.vmem_to_hbm [thread:$0]  (%p5451_p8), %s2504_s21, 16, %s2501_s26, %s2458_s10  }
 0xf05 PF: > { %s5453_s11 = sld [smem:[#allocation50_spill]]  ;;  %s5454_s22 = sld [smem:[#allocation43_spill]] }
 0xf06   : > { %s5455_s4 = sld [smem:[#allocation59_spill]] }
 0xf0b   : > { %p3265_p11 = scmp.ge.s32.totalorder %s5453_s11, 2  ;;  %s2515_s28 = sand.u32 1, %s5454_s22  }
 0xf0c   : > { %p5456_p9 = scmp.ne.s32.totalorder %s5455_s4, 0  ;;  %s2516_s3 = scalar_lea.sflag [#allocation6], %s2515_s28 }
 0xf0e   : > { %p3251_p13 = pnand %p3265_p11, %p5456_p9 }
 0xf10   : > { %3983 = dma.done.wait (!%p3251_p13), %s2516_s3, 128  }
 0xf11   : > { %3985 = vsyncadd (!%p3251_p13), %s2516_s3, 4294967168  ;;  %s5457_s25 = sadd.s32 4294967294, %s5453_s11   ;;  %s5458_s19 = sld [smem:[#allocation60_spill]] }
 0xf12   : > { %s2524_s8 = sand.u32 1, %s5457_s25  }
 0xf13   : > { %s2525_s13 = scalar_lea.sflag [#allocation22], %s2524_s8 }
 0xf17   : > { %p5459_p1 = scmp.ne.s32.totalorder %s5458_s19, 0 }
 0xf19   : > { %p3254_p0 = pnand %p3265_p11, %p5459_p1 }
 0xf1b   : > { %3987 = dma.done.wait (!%p3254_p0), %s2525_s13, 128  }
 0xf1c   : > { %3989 = vsyncadd (!%p3254_p0), %s2525_s13, 4294967168 }
 0xf1d   : > { %3991 = dma.done.wait (!%p3251_p13), %s2525_s13, 16  }
 0xf1e   : > { %3993 = vsyncadd (!%p3251_p13), %s2525_s13, 4294967280  ;;  %s50_s6 = sadd.s32 1, %s5453_s11   ;;  %s5461_s27 = sld [smem:[#allocation39_spill]] }
 0xf1f   : > { %p5169_p8 = scmp.ge.s32.totalorder %s50_s6, 6   ;;  %s5462_s3 = sld [smem:[#allocation40_spill]] }
 0xf20   : > { %s5463_s7 = sld [smem:[#allocation61_spill]]  ;;  %s5464_s28 = sld [smem:[#allocation41_spill]] }
 0xf21   : > { %s5465_s8 = sld [smem:[#allocation42_spill]]  ;;  %s5466_s4 = sld [smem:[#allocation57_spill]] }
 0xf22   : > { %s5467_s29 = sld [smem:[#allocation44_spill]]  ;;  %s5468_s0 = sld [smem:[#allocation45_spill]] }
 0xf23   : > { %s5469_s9 = sld [smem:[#allocation58_spill]]  ;;  %s5470_s30 = sld [smem:[#allocation48_spill]] }
 0xf24   : > { %s5471_s2 = sld [smem:[#allocation49_spill]]  ;;  %s5472_s5 = sld [smem:[#allocation53_spill]] }
 0xf25   : > { %s5473_s10 = sld [smem:[#allocation55_spill]]  ;;  %49 = sbr.rel (!%p5169_p8) target bundleno = 43 (0x2b), region = 334 }
 0xf2c   :  { %2538 = vsyncpa [#allocation5], 1 }
 0xf2d   :  { %2540 = vsyncpa [#allocation5 + $0x1], 1 }
 0xf2e   :  { %2541 = vsyncpa [#allocation8], 1 }
 0xf2f   :  { %2543 = vsyncpa [#allocation8 + $0x1], 1 }
 0xf30   :  { %2544 = vsyncpa [#allocation11], 1 }
 0xf31   :  { %2545 = vsyncpa [#allocation6], 1 }
 0xf32   :  { %2547 = vsyncpa [#allocation6 + $0x1], 1 }
 0xf33   :  { %2548 = vsyncpa [#allocation22], 1 }
 0xf34   :  { %2550 = vsyncpa [#allocation22 + $0x1], 1 }

</bundles_post_ra>
